<compile_context>
chip_gen: v7x
topology: tpu7x:2x2x1
jax: 0.10.0
libtpu: 0.0.40
codegen_flags: <defaults>
</compile_context>

<pallas_src>
import jax
import jax.numpy as jnp
from jax import lax
from jax.experimental import pallas as pl
from jax.experimental.pallas import tpu as pltpu
import numpy as np


# ----------------------------------------------------------------------------- kernel
def lstm_extractor_kernel(x_ref,       # (T, B, F)   matmul dtype (bf16)
                          wih0_ref,    # (F, 4H)     bf16, gate order [i,f,o,g]
                          whh0_ref,    # (H, 4H)     bf16
                          b0_ref,      # (1, 4H)     f32  (b_ih0 + b_hh0)
                          w1_ref,      # (2H, 4H)    bf16, stacked [W_ih1; W_hh1]
                          b1_ref,      # (1, 4H)     f32  (b_ih1 + b_hh1)
                          out_ref,     # (B, H)      f32  = h_n of last layer
                          xproj_ref):  # scratch VMEM (T, B, 4H) f32
    T, B, F = x_ref.shape
    H = out_ref.shape[1]
    H3 = 3 * H
    cdt = whh0_ref.dtype  # matmul compute dtype (bf16)

    # ---- hoisted layer-0 input projection: one big MXU matmul over all time steps ----
    x_all = x_ref[...].reshape(T * B, F)
    proj = jnp.dot(x_all, wih0_ref[...], preferred_element_type=jnp.float32)
    xproj_ref[...] = (proj + b0_ref[...]).reshape(T, B, 4 * H)

    # Hoist weight / bias loads out of the recurrent loop (live in vregs).
    whh0 = whh0_ref[...]
    w1 = w1_ref[...]
    b1 = b1_ref[...]

    def gates_to_state(gates, c_prev):
        # Gate order [i, f, o, g]: one sigmoid over 3H contiguous lanes, one tanh over H.
        sig = jax.nn.sigmoid(gates[:, :H3])
        g = jnp.tanh(gates[:, H3:])
        i = sig[:, 0:H]
        f = sig[:, H:2 * H]
        o = sig[:, 2 * H:H3]
        c_new = f * c_prev + i * g
        h_new = o * jnp.tanh(c_new)
        return h_new, c_new

    def step(t, carry):
        h0, c0, h1, c1 = carry

        # Layer 0: recurrent half only (input projection + bias precomputed above).
        g0 = xproj_ref[t] + jnp.dot(h0.astype(cdt), whh0,
                                    preferred_element_type=jnp.float32)
        h0n, c0n = gates_to_state(g0, c0)

        # Layer 1: single fused matmul on [h0_t, h1_{t-1}]  (K = 2H).
        hcat = jnp.concatenate([h0n, h1], axis=1).astype(cdt)
        g1 = jnp.dot(hcat, w1, preferred_element_type=jnp.float32) + b1
        h1n, c1n = gates_to_state(g1, c1)

        return (h0n, c0n, h1n, c1n)

    z = jnp.zeros((B, H), jnp.float32)
    # T is static & small -> full unroll so the scheduler interleaves the two layers
    # and MXU/EUP work across adjacent time steps.
    _, _, h1, _ = lax.fori_loop(0, T, step, (z, z, z, z), unroll=True)

    out_ref[...] = h1


# ----------------------------------------------------------------------------- wrapper
def lstm_extractor(x, packed):
    """x: (B, T, F) float32.  packed: output of pack_params().  Returns h_n[-1]: (B, H) f32."""
    B, T, F = x.shape
    H = packed["whh0"].shape[0]
    cdt = packed["wih0"].dtype

    # time-major for leading-axis time slicing inside the kernel
    x_tm = jnp.transpose(x, (1, 0, 2)).astype(cdt)  # (T, B, F)

    vmem = pl.BlockSpec(memory_space=pltpu.MemorySpace.VMEM)

    return pl.pallas_call(
        lstm_extractor_kernel,
        out_shape=jax.ShapeDtypeStruct((B, H), jnp.float32),
        in_specs=[vmem] * 6,
        out_specs=vmem,
        scratch_shapes=[pltpu.VMEM((T, B, 4 * H), jnp.float32)],
    )(x_tm,
      packed["wih0"], packed["whh0"], packed["b0"],
      packed["w1"], packed["b1"])


# ----------------------------------------------------------------------------- params
def init_raw_params(key, num_features, hidden_size):
    """Raw PyTorch-layout LSTM params, U(-1/sqrt(H), 1/sqrt(H)), gate order [i,f,g,o]."""
    H = hidden_size
    k = 1.0 / np.sqrt(H)
    keys = jax.random.split(key, 8)

    def u(kk, shape):
        return jax.random.uniform(kk, shape, jnp.float32, -k, k)

    return {
        "wih0": u(keys[0], (4 * H, num_features)),
        "whh0": u(keys[1], (4 * H, H)),
        "bih0": u(keys[2], (4 * H,)),
        "bhh0": u(keys[3], (4 * H,)),
        "wih1": u(keys[4], (4 * H, H)),
        "whh1": u(keys[5], (4 * H, H)),
        "bih1": u(keys[6], (4 * H,)),
        "bhh1": u(keys[7], (4 * H,)),
    }


def pack_params(raw, compute_dtype=jnp.bfloat16):
    """Reorder gates [i,f,g,o]->[i,f,o,g], transpose to (in,4H), stack layer-1 weights,
    sum biases, and cast matmul operands to `compute_dtype` (biases stay f32)."""
    H = raw["whh0"].shape[1]
    perm = np.concatenate([np.arange(0, 2 * H),        # i, f
                           np.arange(3 * H, 4 * H),    # o
                           np.arange(2 * H, 3 * H)])   # g

    def ro(w):  # reorder gate rows of a (4H, in) weight
        return w[perm]

    wih0 = ro(raw["wih0"]).T.astype(compute_dtype)                      # (F, 4H)
    whh0 = ro(raw["whh0"]).T.astype(compute_dtype)                      # (H, 4H)
    b0 = (raw["bih0"] + raw["bhh0"])[perm].reshape(1, 4 * H).astype(jnp.float32)
    w1 = jnp.concatenate([ro(raw["wih1"]).T, ro(raw["whh1"]).T],
                         axis=0).astype(compute_dtype)                  # (2H, 4H)
    b1 = (raw["bih1"] + raw["bhh1"])[perm].reshape(1, 4 * H).astype(jnp.float32)

    return {"wih0": wih0, "whh0": whh0, "b0": b0, "w1": w1, "b1": b1}


# ----------------------------------------------------------------------------- reference
def lstm_extractor_ref(x, raw, compute_dtype=jnp.float32):
    """Pure-JAX reference of the 2-layer PyTorch LSTM (batch_first), returns h_n[-1].
    Matmul operands cast to `compute_dtype`, f32 accumulation."""
    B, T, F = x.shape
    H = raw["whh0"].shape[1]

    def cell(x_t, h, c, wih, whh, bih, bhh):
        g = (jnp.dot(x_t.astype(compute_dtype), wih.T.astype(compute_dtype),
                     preferred_element_type=jnp.float32)
             + jnp.dot(h.astype(compute_dtype), whh.T.astype(compute_dtype),
                       preferred_element_type=jnp.float32)
             + bih + bhh)
        i = jax.nn.sigmoid(g[:, 0 * H:1 * H])
        f = jax.nn.sigmoid(g[:, 1 * H:2 * H])
        gg = jnp.tanh(g[:, 2 * H:3 * H])
        o = jax.nn.sigmoid(g[:, 3 * H:4 * H])
        c = f * c + i * gg
        h = o * jnp.tanh(c)
        return h, c

    def scan_fn(carry, x_t):
        h0, c0, h1, c1 = carry
        h0, c0 = cell(x_t, h0, c0, raw["wih0"], raw["whh0"], raw["bih0"], raw["bhh0"])
        h1, c1 = cell(h0, h1, c1, raw["wih1"], raw["whh1"], raw["bih1"], raw["bhh1"])
        return (h0, c0, h1, c1), None

    z = jnp.zeros((B, H), jnp.float32)
    (_, _, h1, _), _ = lax.scan(scan_fn, (z, z, z, z), jnp.transpose(x, (1, 0, 2)))
    return h1


# ----------------------------------------------------------------------------- main
if __name__ == "__main__":
    # Small shapes implied by the module: batch=2, seq=8, num_features=16, hidden=32
    B, T, F, H = 2, 8, 16, 32

    key = jax.random.PRNGKey(0)
    kx, kp = jax.random.split(key)
    x = jax.random.normal(kx, (B, T, F), jnp.float32)
    raw = init_raw_params(kp, num_features=F, hidden_size=H)

    compute_dtype = jnp.bfloat16  # MXU-native matmul operands; f32 accumulation/state
    packed = pack_params(raw, compute_dtype)

    out = jax.block_until_ready(lstm_extractor(x, packed))
    assert out.shape == (B, H)

    # Tight check vs a reference using the same bf16-operand / f32-accumulate matmuls.
    ref_bf16 = lstm_extractor_ref(x, raw, compute_dtype)
    np.testing.assert_allclose(np.asarray(out), np.asarray(ref_bf16),
                               rtol=2e-3, atol=2e-3)

    # Loose sanity check vs full-f32 PyTorch semantics (difference is only bf16 operands).
    ref_f32 = lstm_extractor_ref(x, raw, jnp.float32)
    np.testing.assert_allclose(np.asarray(out), np.asarray(ref_f32),
                               rtol=5e-2, atol=5e-2)

    print("KERNEL_OK")
</pallas_src>

<mosaic_0001>
module attributes {stable_mosaic.version = 11 : i64} {
  func.func @lstm_extractor_kernel(%arg0: memref<8x2x16xbf16, #tpu.memory_space<vmem>>, %arg1: memref<16x128xbf16, #tpu.memory_space<vmem>>, %arg2: memref<32x128xbf16, #tpu.memory_space<vmem>>, %arg3: memref<1x128xf32, #tpu.memory_space<vmem>>, %arg4: memref<64x128xbf16, #tpu.memory_space<vmem>>, %arg5: memref<1x128xf32, #tpu.memory_space<vmem>>, %arg6: memref<2x32xf32, #tpu.memory_space<vmem>>, %arg7: memref<8x2x128xf32, #tpu.memory_space<vmem>>) attributes {dimension_semantics = [], scalar_prefetch = 0 : i64, scratch_operands = 1 : i64, tpu.core_type = #tpu.core_type<tc>} {
    %c0 = arith.constant 0 : index
    %c0_0 = arith.constant 0 : index
    %c0_1 = arith.constant 0 : index
    %0 = vector.load %arg0[%c0, %c0_0, %c0_1] : memref<8x2x16xbf16, #tpu.memory_space<vmem>>, vector<8x2x16xbf16>
    %1 = vector.shape_cast %0 : vector<8x2x16xbf16> to vector<16x16xbf16>
    %c0_2 = arith.constant 0 : index
    %c0_3 = arith.constant 0 : index
    %2 = vector.load %arg1[%c0_2, %c0_3] : memref<16x128xbf16, #tpu.memory_space<vmem>>, vector<16x128xbf16>
    %cst = arith.constant dense<0.000000e+00> : vector<16x128xf32>
    %3 = tpu.matmul %1, %2, %cst {dimension_numbers = #tpu.dot_dimension_numbers<[1], [0], [0], [1], [0, 0, 1, 1], [], []>} : vector<16x16xbf16>, vector<16x128xbf16>, vector<16x128xf32> -> vector<16x128xf32>
    %c0_4 = arith.constant 0 : index
    %c0_5 = arith.constant 0 : index
    %4 = vector.load %arg3[%c0_4, %c0_5] : memref<1x128xf32, #tpu.memory_space<vmem>>, vector<1x128xf32>
    %5 = vector.broadcast %4 : vector<1x128xf32> to vector<16x128xf32>
    %6 = arith.addf %3, %5 : vector<16x128xf32>
    %7 = vector.shape_cast %6 : vector<16x128xf32> to vector<8x2x128xf32>
    %c0_6 = arith.constant 0 : index
    %c0_7 = arith.constant 0 : index
    %c0_8 = arith.constant 0 : index
    %8 = vector.load %arg7[%c0_6, %c0_7, %c0_8] : memref<8x2x128xf32, #tpu.memory_space<vmem>>, vector<8x2x128xf32>
    tpu.vector_store %arg7[%c0_6, %c0_7, %c0_8], %7 {strides = array<i32>} : memref<8x2x128xf32, #tpu.memory_space<vmem>>, vector<8x2x128xf32>,
    %c0_9 = arith.constant 0 : index
    %c0_10 = arith.constant 0 : index
    %9 = vector.load %arg2[%c0_9, %c0_10] : memref<32x128xbf16, #tpu.memory_space<vmem>>, vector<32x128xbf16>
    %c0_11 = arith.constant 0 : index
    %c0_12 = arith.constant 0 : index
    %10 = vector.load %arg4[%c0_11, %c0_12] : memref<64x128xbf16, #tpu.memory_space<vmem>>, vector<64x128xbf16>
    %c0_13 = arith.constant 0 : index
    %c0_14 = arith.constant 0 : index
    %11 = vector.load %arg5[%c0_13, %c0_14] : memref<1x128xf32, #tpu.memory_space<vmem>>, vector<1x128xf32>
    %cst_15 = arith.constant 0.000000e+00 : f32
    %12 = vector.broadcast %cst_15 : f32 to vector<2x32xf32>
    %c0_i32 = arith.constant 0 : i32
    %13 = arith.index_cast %c0_i32 : i32 to index
    %c0_16 = arith.constant 0 : index
    %c0_17 = arith.constant 0 : index
    %14 = vector.load %arg7[%13, %c0_16, %c0_17] : memref<8x2x128xf32, #tpu.memory_space<vmem>>, vector<1x2x128xf32>
    %15 = vector.shape_cast %14 : vector<1x2x128xf32> to vector<2x128xf32>
    %16 = arith.truncf %12 : vector<2x32xf32> to vector<2x32xbf16>
    %cst_18 = arith.constant dense<0.000000e+00> : vector<2x128xf32>
    %17 = tpu.matmul %16, %9, %cst_18 {dimension_numbers = #tpu.dot_dimension_numbers<[1], [0], [0], [1], [0, 0, 1, 1], [], []>} : vector<2x32xbf16>, vector<32x128xbf16>, vector<2x128xf32> -> vector<2x128xf32>
    %18 = arith.addf %15, %17 : vector<2x128xf32>
    %19 = vector.extract_strided_slice %18 {offsets = [0, 0], sizes = [2, 96], strides = [1, 1]} : vector<2x128xf32> to vector<2x96xf32>
    %20 = arith.negf %19 : vector<2x96xf32>
    %21 = math.exp %20 : vector<2x96xf32>
    %cst_19 = arith.constant 1.000000e+00 : f32
    %22 = vector.broadcast %cst_19 : f32 to vector<2x96xf32>
    %23 = arith.addf %22, %21 : vector<2x96xf32>
    %24 = arith.divf %22, %23 : vector<2x96xf32>
    %25 = vector.extract_strided_slice %18 {offsets = [0, 96], sizes = [2, 32], strides = [1, 1]} : vector<2x128xf32> to vector<2x32xf32>
    %26 = math.tanh %25 : vector<2x32xf32>
    %27 = vector.extract_strided_slice %24 {offsets = [0, 0], sizes = [2, 32], strides = [1, 1]} : vector<2x96xf32> to vector<2x32xf32>
    %28 = vector.extract_strided_slice %24 {offsets = [0, 32], sizes = [2, 32], strides = [1, 1]} : vector<2x96xf32> to vector<2x32xf32>
    %29 = vector.extract_strided_slice %24 {offsets = [0, 64], sizes = [2, 32], strides = [1, 1]} : vector<2x96xf32> to vector<2x32xf32>
    %30 = arith.mulf %28, %12 : vector<2x32xf32>
    %31 = arith.mulf %27, %26 : vector<2x32xf32>
    %32 = arith.addf %30, %31 : vector<2x32xf32>
    %33 = math.tanh %32 : vector<2x32xf32>
    %34 = arith.mulf %29, %33 : vector<2x32xf32>
    %35 = tpu.concatenate %34, %12 in 1 : vector<2x32xf32>, vector<2x32xf32> -> vector<2x64xf32>
    %36 = arith.truncf %35 : vector<2x64xf32> to vector<2x64xbf16>
    %cst_20 = arith.constant dense<0.000000e+00> : vector<2x128xf32>
    %37 = tpu.matmul %36, %10, %cst_20 {dimension_numbers = #tpu.dot_dimension_numbers<[1], [0], [0], [1], [0, 0, 1, 1], [], []>} : vector<2x64xbf16>, vector<64x128xbf16>, vector<2x128xf32> -> vector<2x128xf32>
    %38 = vector.broadcast %11 : vector<1x128xf32> to vector<2x128xf32>
    %39 = arith.addf %37, %38 : vector<2x128xf32>
    %40 = vector.extract_strided_slice %39 {offsets = [0, 0], sizes = [2, 96], strides = [1, 1]} : vector<2x128xf32> to vector<2x96xf32>
    %41 = arith.negf %40 : vector<2x96xf32>
    %42 = math.exp %41 : vector<2x96xf32>
    %cst_21 = arith.constant 1.000000e+00 : f32
    %43 = vector.broadcast %cst_21 : f32 to vector<2x96xf32>
    %44 = arith.addf %43, %42 : vector<2x96xf32>
    %45 = arith.divf %43, %44 : vector<2x96xf32>
    %46 = vector.extract_strided_slice %39 {offsets = [0, 96], sizes = [2, 32], strides = [1, 1]} : vector<2x128xf32> to vector<2x32xf32>
    %47 = math.tanh %46 : vector<2x32xf32>
    %48 = vector.extract_strided_slice %45 {offsets = [0, 0], sizes = [2, 32], strides = [1, 1]} : vector<2x96xf32> to vector<2x32xf32>
    %49 = vector.extract_strided_slice %45 {offsets = [0, 32], sizes = [2, 32], strides = [1, 1]} : vector<2x96xf32> to vector<2x32xf32>
    %50 = vector.extract_strided_slice %45 {offsets = [0, 64], sizes = [2, 32], strides = [1, 1]} : vector<2x96xf32> to vector<2x32xf32>
    %51 = arith.mulf %49, %12 : vector<2x32xf32>
    %52 = arith.mulf %48, %47 : vector<2x32xf32>
    %53 = arith.addf %51, %52 : vector<2x32xf32>
    %54 = math.tanh %53 : vector<2x32xf32>
    %55 = arith.mulf %50, %54 : vector<2x32xf32>
    %c1_i32 = arith.constant 1 : i32
    %56 = arith.index_cast %c1_i32 : i32 to index
    %c0_22 = arith.constant 0 : index
    %c0_23 = arith.constant 0 : index
    %57 = vector.load %arg7[%56, %c0_22, %c0_23] : memref<8x2x128xf32, #tpu.memory_space<vmem>>, vector<1x2x128xf32>
    %58 = vector.shape_cast %57 : vector<1x2x128xf32> to vector<2x128xf32>
    %59 = arith.truncf %34 : vector<2x32xf32> to vector<2x32xbf16>
    %cst_24 = arith.constant dense<0.000000e+00> : vector<2x128xf32>
    %60 = tpu.matmul %59, %9, %cst_24 {dimension_numbers = #tpu.dot_dimension_numbers<[1], [0], [0], [1], [0, 0, 1, 1], [], []>} : vector<2x32xbf16>, vector<32x128xbf16>, vector<2x128xf32> -> vector<2x128xf32>
    %61 = arith.addf %58, %60 : vector<2x128xf32>
    %62 = vector.extract_strided_slice %61 {offsets = [0, 0], sizes = [2, 96], strides = [1, 1]} : vector<2x128xf32> to vector<2x96xf32>
    %63 = arith.negf %62 : vector<2x96xf32>
    %64 = math.exp %63 : vector<2x96xf32>
    %cst_25 = arith.constant 1.000000e+00 : f32
    %65 = vector.broadcast %cst_25 : f32 to vector<2x96xf32>
    %66 = arith.addf %65, %64 : vector<2x96xf32>
    %67 = arith.divf %65, %66 : vector<2x96xf32>
    %68 = vector.extract_strided_slice %61 {offsets = [0, 96], sizes = [2, 32], strides = [1, 1]} : vector<2x128xf32> to vector<2x32xf32>
    %69 = math.tanh %68 : vector<2x32xf32>
    %70 = vector.extract_strided_slice %67 {offsets = [0, 0], sizes = [2, 32], strides = [1, 1]} : vector<2x96xf32> to vector<2x32xf32>
    %71 = vector.extract_strided_slice %67 {offsets = [0, 32], sizes = [2, 32], strides = [1, 1]} : vector<2x96xf32> to vector<2x32xf32>
    %72 = vector.extract_strided_slice %67 {offsets = [0, 64], sizes = [2, 32], strides = [1, 1]} : vector<2x96xf32> to vector<2x32xf32>
    %73 = arith.mulf %71, %32 : vector<2x32xf32>
    %74 = arith.mulf %70, %69 : vector<2x32xf32>
    %75 = arith.addf %73, %74 : vector<2x32xf32>
    %76 = math.tanh %75 : vector<2x32xf32>
    %77 = arith.mulf %72, %76 : vector<2x32xf32>
    %78 = tpu.concatenate %77, %55 in 1 : vector<2x32xf32>, vector<2x32xf32> -> vector<2x64xf32>
    %79 = arith.truncf %78 : vector<2x64xf32> to vector<2x64xbf16>
    %cst_26 = arith.constant dense<0.000000e+00> : vector<2x128xf32>
    %80 = tpu.matmul %79, %10, %cst_26 {dimension_numbers = #tpu.dot_dimension_numbers<[1], [0], [0], [1], [0, 0, 1, 1], [], []>} : vector<2x64xbf16>, vector<64x128xbf16>, vector<2x128xf32> -> vector<2x128xf32>
    %81 = vector.broadcast %11 : vector<1x128xf32> to vector<2x128xf32>
    %82 = arith.addf %80, %81 : vector<2x128xf32>
    %83 = vector.extract_strided_slice %82 {offsets = [0, 0], sizes = [2, 96], strides = [1, 1]} : vector<2x128xf32> to vector<2x96xf32>
    %84 = arith.negf %83 : vector<2x96xf32>
    %85 = math.exp %84 : vector<2x96xf32>
    %cst_27 = arith.constant 1.000000e+00 : f32
    %86 = vector.broadcast %cst_27 : f32 to vector<2x96xf32>
    %87 = arith.addf %86, %85 : vector<2x96xf32>
    %88 = arith.divf %86, %87 : vector<2x96xf32>
    %89 = vector.extract_strided_slice %82 {offsets = [0, 96], sizes = [2, 32], strides = [1, 1]} : vector<2x128xf32> to vector<2x32xf32>
    %90 = math.tanh %89 : vector<2x32xf32>
    %91 = vector.extract_strided_slice %88 {offsets = [0, 0], sizes = [2, 32], strides = [1, 1]} : vector<2x96xf32> to vector<2x32xf32>
    %92 = vector.extract_strided_slice %88 {offsets = [0, 32], sizes = [2, 32], strides = [1, 1]} : vector<2x96xf32> to vector<2x32xf32>
    %93 = vector.extract_strided_slice %88 {offsets = [0, 64], sizes = [2, 32], strides = [1, 1]} : vector<2x96xf32> to vector<2x32xf32>
    %94 = arith.mulf %92, %53 : vector<2x32xf32>
    %95 = arith.mulf %91, %90 : vector<2x32xf32>
    %96 = arith.addf %94, %95 : vector<2x32xf32>
    %97 = math.tanh %96 : vector<2x32xf32>
    %98 = arith.mulf %93, %97 : vector<2x32xf32>
    %c2_i32 = arith.constant 2 : i32
    %99 = arith.index_cast %c2_i32 : i32 to index
    %c0_28 = arith.constant 0 : index
    %c0_29 = arith.constant 0 : index
    %100 = vector.load %arg7[%99, %c0_28, %c0_29] : memref<8x2x128xf32, #tpu.memory_space<vmem>>, vector<1x2x128xf32>
    %101 = vector.shape_cast %100 : vector<1x2x128xf32> to vector<2x128xf32>
    %102 = arith.truncf %77 : vector<2x32xf32> to vector<2x32xbf16>
    %cst_30 = arith.constant dense<0.000000e+00> : vector<2x128xf32>
    %103 = tpu.matmul %102, %9, %cst_30 {dimension_numbers = #tpu.dot_dimension_numbers<[1], [0], [0], [1], [0, 0, 1, 1], [], []>} : vector<2x32xbf16>, vector<32x128xbf16>, vector<2x128xf32> -> vector<2x128xf32>
    %104 = arith.addf %101, %103 : vector<2x128xf32>
    %105 = vector.extract_strided_slice %104 {offsets = [0, 0], sizes = [2, 96], strides = [1, 1]} : vector<2x128xf32> to vector<2x96xf32>
    %106 = arith.negf %105 : vector<2x96xf32>
    %107 = math.exp %106 : vector<2x96xf32>
    %cst_31 = arith.constant 1.000000e+00 : f32
    %108 = vector.broadcast %cst_31 : f32 to vector<2x96xf32>
    %109 = arith.addf %108, %107 : vector<2x96xf32>
    %110 = arith.divf %108, %109 : vector<2x96xf32>
    %111 = vector.extract_strided_slice %104 {offsets = [0, 96], sizes = [2, 32], strides = [1, 1]} : vector<2x128xf32> to vector<2x32xf32>
    %112 = math.tanh %111 : vector<2x32xf32>
    %113 = vector.extract_strided_slice %110 {offsets = [0, 0], sizes = [2, 32], strides = [1, 1]} : vector<2x96xf32> to vector<2x32xf32>
    %114 = vector.extract_strided_slice %110 {offsets = [0, 32], sizes = [2, 32], strides = [1, 1]} : vector<2x96xf32> to vector<2x32xf32>
    %115 = vector.extract_strided_slice %110 {offsets = [0, 64], sizes = [2, 32], strides = [1, 1]} : vector<2x96xf32> to vector<2x32xf32>
    %116 = arith.mulf %114, %75 : vector<2x32xf32>
    %117 = arith.mulf %113, %112 : vector<2x32xf32>
    %118 = arith.addf %116, %117 : vector<2x32xf32>
    %119 = math.tanh %118 : vector<2x32xf32>
    %120 = arith.mulf %115, %119 : vector<2x32xf32>
    %121 = tpu.concatenate %120, %98 in 1 : vector<2x32xf32>, vector<2x32xf32> -> vector<2x64xf32>
    %122 = arith.truncf %121 : vector<2x64xf32> to vector<2x64xbf16>
    %cst_32 = arith.constant dense<0.000000e+00> : vector<2x128xf32>
    %123 = tpu.matmul %122, %10, %cst_32 {dimension_numbers = #tpu.dot_dimension_numbers<[1], [0], [0], [1], [0, 0, 1, 1], [], []>} : vector<2x64xbf16>, vector<64x128xbf16>, vector<2x128xf32> -> vector<2x128xf32>
    %124 = vector.broadcast %11 : vector<1x128xf32> to vector<2x128xf32>
    %125 = arith.addf %123, %124 : vector<2x128xf32>
    %126 = vector.extract_strided_slice %125 {offsets = [0, 0], sizes = [2, 96], strides = [1, 1]} : vector<2x128xf32> to vector<2x96xf32>
    %127 = arith.negf %126 : vector<2x96xf32>
    %128 = math.exp %127 : vector<2x96xf32>
    %cst_33 = arith.constant 1.000000e+00 : f32
    %129 = vector.broadcast %cst_33 : f32 to vector<2x96xf32>
    %130 = arith.addf %129, %128 : vector<2x96xf32>
    %131 = arith.divf %129, %130 : vector<2x96xf32>
    %132 = vector.extract_strided_slice %125 {offsets = [0, 96], sizes = [2, 32], strides = [1, 1]} : vector<2x128xf32> to vector<2x32xf32>
    %133 = math.tanh %132 : vector<2x32xf32>
    %134 = vector.extract_strided_slice %131 {offsets = [0, 0], sizes = [2, 32], strides = [1, 1]} : vector<2x96xf32> to vector<2x32xf32>
    %135 = vector.extract_strided_slice %131 {offsets = [0, 32], sizes = [2, 32], strides = [1, 1]} : vector<2x96xf32> to vector<2x32xf32>
    %136 = vector.extract_strided_slice %131 {offsets = [0, 64], sizes = [2, 32], strides = [1, 1]} : vector<2x96xf32> to vector<2x32xf32>
    %137 = arith.mulf %135, %96 : vector<2x32xf32>
    %138 = arith.mulf %134, %133 : vector<2x32xf32>
    %139 = arith.addf %137, %138 : vector<2x32xf32>
    %140 = math.tanh %139 : vector<2x32xf32>
    %141 = arith.mulf %136, %140 : vector<2x32xf32>
    %c3_i32 = arith.constant 3 : i32
    %142 = arith.index_cast %c3_i32 : i32 to index
    %c0_34 = arith.constant 0 : index
    %c0_35 = arith.constant 0 : index
    %143 = vector.load %arg7[%142, %c0_34, %c0_35] : memref<8x2x128xf32, #tpu.memory_space<vmem>>, vector<1x2x128xf32>
    %144 = vector.shape_cast %143 : vector<1x2x128xf32> to vector<2x128xf32>
    %145 = arith.truncf %120 : vector<2x32xf32> to vector<2x32xbf16>
    %cst_36 = arith.constant dense<0.000000e+00> : vector<2x128xf32>
    %146 = tpu.matmul %145, %9, %cst_36 {dimension_numbers = #tpu.dot_dimension_numbers<[1], [0], [0], [1], [0, 0, 1, 1], [], []>} : vector<2x32xbf16>, vector<32x128xbf16>, vector<2x128xf32> -> vector<2x128xf32>
    %147 = arith.addf %144, %146 : vector<2x128xf32>
    %148 = vector.extract_strided_slice %147 {offsets = [0, 0], sizes = [2, 96], strides = [1, 1]} : vector<2x128xf32> to vector<2x96xf32>
    %149 = arith.negf %148 : vector<2x96xf32>
    %150 = math.exp %149 : vector<2x96xf32>
    %cst_37 = arith.constant 1.000000e+00 : f32
    %151 = vector.broadcast %cst_37 : f32 to vector<2x96xf32>
    %152 = arith.addf %151, %150 : vector<2x96xf32>
    %153 = arith.divf %151, %152 : vector<2x96xf32>
    %154 = vector.extract_strided_slice %147 {offsets = [0, 96], sizes = [2, 32], strides = [1, 1]} : vector<2x128xf32> to vector<2x32xf32>
    %155 = math.tanh %154 : vector<2x32xf32>
    %156 = vector.extract_strided_slice %153 {offsets = [0, 0], sizes = [2, 32], strides = [1, 1]} : vector<2x96xf32> to vector<2x32xf32>
    %157 = vector.extract_strided_slice %153 {offsets = [0, 32], sizes = [2, 32], strides = [1, 1]} : vector<2x96xf32> to vector<2x32xf32>
    %158 = vector.extract_strided_slice %153 {offsets = [0, 64], sizes = [2, 32], strides = [1, 1]} : vector<2x96xf32> to vector<2x32xf32>
    %159 = arith.mulf %157, %118 : vector<2x32xf32>
    %160 = arith.mulf %156, %155 : vector<2x32xf32>
    %161 = arith.addf %159, %160 : vector<2x32xf32>
    %162 = math.tanh %161 : vector<2x32xf32>
    %163 = arith.mulf %158, %162 : vector<2x32xf32>
    %164 = tpu.concatenate %163, %141 in 1 : vector<2x32xf32>, vector<2x32xf32> -> vector<2x64xf32>
    %165 = arith.truncf %164 : vector<2x64xf32> to vector<2x64xbf16>
    %cst_38 = arith.constant dense<0.000000e+00> : vector<2x128xf32>
    %166 = tpu.matmul %165, %10, %cst_38 {dimension_numbers = #tpu.dot_dimension_numbers<[1], [0], [0], [1], [0, 0, 1, 1], [], []>} : vector<2x64xbf16>, vector<64x128xbf16>, vector<2x128xf32> -> vector<2x128xf32>
    %167 = vector.broadcast %11 : vector<1x128xf32> to vector<2x128xf32>
    %168 = arith.addf %166, %167 : vector<2x128xf32>
    %169 = vector.extract_strided_slice %168 {offsets = [0, 0], sizes = [2, 96], strides = [1, 1]} : vector<2x128xf32> to vector<2x96xf32>
    %170 = arith.negf %169 : vector<2x96xf32>
    %171 = math.exp %170 : vector<2x96xf32>
    %cst_39 = arith.constant 1.000000e+00 : f32
    %172 = vector.broadcast %cst_39 : f32 to vector<2x96xf32>
    %173 = arith.addf %172, %171 : vector<2x96xf32>
    %174 = arith.divf %172, %173 : vector<2x96xf32>
    %175 = vector.extract_strided_slice %168 {offsets = [0, 96], sizes = [2, 32], strides = [1, 1]} : vector<2x128xf32> to vector<2x32xf32>
    %176 = math.tanh %175 : vector<2x32xf32>
    %177 = vector.extract_strided_slice %174 {offsets = [0, 0], sizes = [2, 32], strides = [1, 1]} : vector<2x96xf32> to vector<2x32xf32>
    %178 = vector.extract_strided_slice %174 {offsets = [0, 32], sizes = [2, 32], strides = [1, 1]} : vector<2x96xf32> to vector<2x32xf32>
    %179 = vector.extract_strided_slice %174 {offsets = [0, 64], sizes = [2, 32], strides = [1, 1]} : vector<2x96xf32> to vector<2x32xf32>
    %180 = arith.mulf %178, %139 : vector<2x32xf32>
    %181 = arith.mulf %177, %176 : vector<2x32xf32>
    %182 = arith.addf %180, %181 : vector<2x32xf32>
    %183 = math.tanh %182 : vector<2x32xf32>
    %184 = arith.mulf %179, %183 : vector<2x32xf32>
    %c4_i32 = arith.constant 4 : i32
    %185 = arith.index_cast %c4_i32 : i32 to index
    %c0_40 = arith.constant 0 : index
    %c0_41 = arith.constant 0 : index
    %186 = vector.load %arg7[%185, %c0_40, %c0_41] : memref<8x2x128xf32, #tpu.memory_space<vmem>>, vector<1x2x128xf32>
    %187 = vector.shape_cast %186 : vector<1x2x128xf32> to vector<2x128xf32>
    %188 = arith.truncf %163 : vector<2x32xf32> to vector<2x32xbf16>
    %cst_42 = arith.constant dense<0.000000e+00> : vector<2x128xf32>
    %189 = tpu.matmul %188, %9, %cst_42 {dimension_numbers = #tpu.dot_dimension_numbers<[1], [0], [0], [1], [0, 0, 1, 1], [], []>} : vector<2x32xbf16>, vector<32x128xbf16>, vector<2x128xf32> -> vector<2x128xf32>
    %190 = arith.addf %187, %189 : vector<2x128xf32>
    %191 = vector.extract_strided_slice %190 {offsets = [0, 0], sizes = [2, 96], strides = [1, 1]} : vector<2x128xf32> to vector<2x96xf32>
    %192 = arith.negf %191 : vector<2x96xf32>
    %193 = math.exp %192 : vector<2x96xf32>
    %cst_43 = arith.constant 1.000000e+00 : f32
    %194 = vector.broadcast %cst_43 : f32 to vector<2x96xf32>
    %195 = arith.addf %194, %193 : vector<2x96xf32>
    %196 = arith.divf %194, %195 : vector<2x96xf32>
    %197 = vector.extract_strided_slice %190 {offsets = [0, 96], sizes = [2, 32], strides = [1, 1]} : vector<2x128xf32> to vector<2x32xf32>
    %198 = math.tanh %197 : vector<2x32xf32>
    %199 = vector.extract_strided_slice %196 {offsets = [0, 0], sizes = [2, 32], strides = [1, 1]} : vector<2x96xf32> to vector<2x32xf32>
    %200 = vector.extract_strided_slice %196 {offsets = [0, 32], sizes = [2, 32], strides = [1, 1]} : vector<2x96xf32> to vector<2x32xf32>
    %201 = vector.extract_strided_slice %196 {offsets = [0, 64], sizes = [2, 32], strides = [1, 1]} : vector<2x96xf32> to vector<2x32xf32>
    %202 = arith.mulf %200, %161 : vector<2x32xf32>
    %203 = arith.mulf %199, %198 : vector<2x32xf32>
    %204 = arith.addf %202, %203 : vector<2x32xf32>
    %205 = math.tanh %204 : vector<2x32xf32>
    %206 = arith.mulf %201, %205 : vector<2x32xf32>
    %207 = tpu.concatenate %206, %184 in 1 : vector<2x32xf32>, vector<2x32xf32> -> vector<2x64xf32>
    %208 = arith.truncf %207 : vector<2x64xf32> to vector<2x64xbf16>
    %cst_44 = arith.constant dense<0.000000e+00> : vector<2x128xf32>
    %209 = tpu.matmul %208, %10, %cst_44 {dimension_numbers = #tpu.dot_dimension_numbers<[1], [0], [0], [1], [0, 0, 1, 1], [], []>} : vector<2x64xbf16>, vector<64x128xbf16>, vector<2x128xf32> -> vector<2x128xf32>
    %210 = vector.broadcast %11 : vector<1x128xf32> to vector<2x128xf32>
    %211 = arith.addf %209, %210 : vector<2x128xf32>
    %212 = vector.extract_strided_slice %211 {offsets = [0, 0], sizes = [2, 96], strides = [1, 1]} : vector<2x128xf32> to vector<2x96xf32>
    %213 = arith.negf %212 : vector<2x96xf32>
    %214 = math.exp %213 : vector<2x96xf32>
    %cst_45 = arith.constant 1.000000e+00 : f32
    %215 = vector.broadcast %cst_45 : f32 to vector<2x96xf32>
    %216 = arith.addf %215, %214 : vector<2x96xf32>
    %217 = arith.divf %215, %216 : vector<2x96xf32>
    %218 = vector.extract_strided_slice %211 {offsets = [0, 96], sizes = [2, 32], strides = [1, 1]} : vector<2x128xf32> to vector<2x32xf32>
    %219 = math.tanh %218 : vector<2x32xf32>
    %220 = vector.extract_strided_slice %217 {offsets = [0, 0], sizes = [2, 32], strides = [1, 1]} : vector<2x96xf32> to vector<2x32xf32>
    %221 = vector.extract_strided_slice %217 {offsets = [0, 32], sizes = [2, 32], strides = [1, 1]} : vector<2x96xf32> to vector<2x32xf32>
    %222 = vector.extract_strided_slice %217 {offsets = [0, 64], sizes = [2, 32], strides = [1, 1]} : vector<2x96xf32> to vector<2x32xf32>
    %223 = arith.mulf %221, %182 : vector<2x32xf32>
    %224 = arith.mulf %220, %219 : vector<2x32xf32>
    %225 = arith.addf %223, %224 : vector<2x32xf32>
    %226 = math.tanh %225 : vector<2x32xf32>
    %227 = arith.mulf %222, %226 : vector<2x32xf32>
    %c5_i32 = arith.constant 5 : i32
    %228 = arith.index_cast %c5_i32 : i32 to index
    %c0_46 = arith.constant 0 : index
    %c0_47 = arith.constant 0 : index
    %229 = vector.load %arg7[%228, %c0_46, %c0_47] : memref<8x2x128xf32, #tpu.memory_space<vmem>>, vector<1x2x128xf32>
    %230 = vector.shape_cast %229 : vector<1x2x128xf32> to vector<2x128xf32>
    %231 = arith.truncf %206 : vector<2x32xf32> to vector<2x32xbf16>
    %cst_48 = arith.constant dense<0.000000e+00> : vector<2x128xf32>
    %232 = tpu.matmul %231, %9, %cst_48 {dimension_numbers = #tpu.dot_dimension_numbers<[1], [0], [0], [1], [0, 0, 1, 1], [], []>} : vector<2x32xbf16>, vector<32x128xbf16>, vector<2x128xf32> -> vector<2x128xf32>
    %233 = arith.addf %230, %232 : vector<2x128xf32>
    %234 = vector.extract_strided_slice %233 {offsets = [0, 0], sizes = [2, 96], strides = [1, 1]} : vector<2x128xf32> to vector<2x96xf32>
    %235 = arith.negf %234 : vector<2x96xf32>
    %236 = math.exp %235 : vector<2x96xf32>
    %cst_49 = arith.constant 1.000000e+00 : f32
    %237 = vector.broadcast %cst_49 : f32 to vector<2x96xf32>
    %238 = arith.addf %237, %236 : vector<2x96xf32>
    %239 = arith.divf %237, %238 : vector<2x96xf32>
    %240 = vector.extract_strided_slice %233 {offsets = [0, 96], sizes = [2, 32], strides = [1, 1]} : vector<2x128xf32> to vector<2x32xf32>
    %241 = math.tanh %240 : vector<2x32xf32>
    %242 = vector.extract_strided_slice %239 {offsets = [0, 0], sizes = [2, 32], strides = [1, 1]} : vector<2x96xf32> to vector<2x32xf32>
    %243 = vector.extract_strided_slice %239 {offsets = [0, 32], sizes = [2, 32], strides = [1, 1]} : vector<2x96xf32> to vector<2x32xf32>
    %244 = vector.extract_strided_slice %239 {offsets = [0, 64], sizes = [2, 32], strides = [1, 1]} : vector<2x96xf32> to vector<2x32xf32>
    %245 = arith.mulf %243, %204 : vector<2x32xf32>
    %246 = arith.mulf %242, %241 : vector<2x32xf32>
    %247 = arith.addf %245, %246 : vector<2x32xf32>
    %248 = math.tanh %247 : vector<2x32xf32>
    %249 = arith.mulf %244, %248 : vector<2x32xf32>
    %250 = tpu.concatenate %249, %227 in 1 : vector<2x32xf32>, vector<2x32xf32> -> vector<2x64xf32>
    %251 = arith.truncf %250 : vector<2x64xf32> to vector<2x64xbf16>
    %cst_50 = arith.constant dense<0.000000e+00> : vector<2x128xf32>
    %252 = tpu.matmul %251, %10, %cst_50 {dimension_numbers = #tpu.dot_dimension_numbers<[1], [0], [0], [1], [0, 0, 1, 1], [], []>} : vector<2x64xbf16>, vector<64x128xbf16>, vector<2x128xf32> -> vector<2x128xf32>
    %253 = vector.broadcast %11 : vector<1x128xf32> to vector<2x128xf32>
    %254 = arith.addf %252, %253 : vector<2x128xf32>
    %255 = vector.extract_strided_slice %254 {offsets = [0, 0], sizes = [2, 96], strides = [1, 1]} : vector<2x128xf32> to vector<2x96xf32>
    %256 = arith.negf %255 : vector<2x96xf32>
    %257 = math.exp %256 : vector<2x96xf32>
    %cst_51 = arith.constant 1.000000e+00 : f32
    %258 = vector.broadcast %cst_51 : f32 to vector<2x96xf32>
    %259 = arith.addf %258, %257 : vector<2x96xf32>
    %260 = arith.divf %258, %259 : vector<2x96xf32>
    %261 = vector.extract_strided_slice %254 {offsets = [0, 96], sizes = [2, 32], strides = [1, 1]} : vector<2x128xf32> to vector<2x32xf32>
    %262 = math.tanh %261 : vector<2x32xf32>
    %263 = vector.extract_strided_slice %260 {offsets = [0, 0], sizes = [2, 32], strides = [1, 1]} : vector<2x96xf32> to vector<2x32xf32>
    %264 = vector.extract_strided_slice %260 {offsets = [0, 32], sizes = [2, 32], strides = [1, 1]} : vector<2x96xf32> to vector<2x32xf32>
    %265 = vector.extract_strided_slice %260 {offsets = [0, 64], sizes = [2, 32], strides = [1, 1]} : vector<2x96xf32> to vector<2x32xf32>
    %266 = arith.mulf %264, %225 : vector<2x32xf32>
    %267 = arith.mulf %263, %262 : vector<2x32xf32>
    %268 = arith.addf %266, %267 : vector<2x32xf32>
    %269 = math.tanh %268 : vector<2x32xf32>
    %270 = arith.mulf %265, %269 : vector<2x32xf32>
    %c6_i32 = arith.constant 6 : i32
    %271 = arith.index_cast %c6_i32 : i32 to index
    %c0_52 = arith.constant 0 : index
    %c0_53 = arith.constant 0 : index
    %272 = vector.load %arg7[%271, %c0_52, %c0_53] : memref<8x2x128xf32, #tpu.memory_space<vmem>>, vector<1x2x128xf32>
    %273 = vector.shape_cast %272 : vector<1x2x128xf32> to vector<2x128xf32>
    %274 = arith.truncf %249 : vector<2x32xf32> to vector<2x32xbf16>
    %cst_54 = arith.constant dense<0.000000e+00> : vector<2x128xf32>
    %275 = tpu.matmul %274, %9, %cst_54 {dimension_numbers = #tpu.dot_dimension_numbers<[1], [0], [0], [1], [0, 0, 1, 1], [], []>} : vector<2x32xbf16>, vector<32x128xbf16>, vector<2x128xf32> -> vector<2x128xf32>
    %276 = arith.addf %273, %275 : vector<2x128xf32>
    %277 = vector.extract_strided_slice %276 {offsets = [0, 0], sizes = [2, 96], strides = [1, 1]} : vector<2x128xf32> to vector<2x96xf32>
    %278 = arith.negf %277 : vector<2x96xf32>
    %279 = math.exp %278 : vector<2x96xf32>
    %cst_55 = arith.constant 1.000000e+00 : f32
    %280 = vector.broadcast %cst_55 : f32 to vector<2x96xf32>
    %281 = arith.addf %280, %279 : vector<2x96xf32>
    %282 = arith.divf %280, %281 : vector<2x96xf32>
    %283 = vector.extract_strided_slice %276 {offsets = [0, 96], sizes = [2, 32], strides = [1, 1]} : vector<2x128xf32> to vector<2x32xf32>
    %284 = math.tanh %283 : vector<2x32xf32>
    %285 = vector.extract_strided_slice %282 {offsets = [0, 0], sizes = [2, 32], strides = [1, 1]} : vector<2x96xf32> to vector<2x32xf32>
    %286 = vector.extract_strided_slice %282 {offsets = [0, 32], sizes = [2, 32], strides = [1, 1]} : vector<2x96xf32> to vector<2x32xf32>
    %287 = vector.extract_strided_slice %282 {offsets = [0, 64], sizes = [2, 32], strides = [1, 1]} : vector<2x96xf32> to vector<2x32xf32>
    %288 = arith.mulf %286, %247 : vector<2x32xf32>
    %289 = arith.mulf %285, %284 : vector<2x32xf32>
    %290 = arith.addf %288, %289 : vector<2x32xf32>
    %291 = math.tanh %290 : vector<2x32xf32>
    %292 = arith.mulf %287, %291 : vector<2x32xf32>
    %293 = tpu.concatenate %292, %270 in 1 : vector<2x32xf32>, vector<2x32xf32> -> vector<2x64xf32>
    %294 = arith.truncf %293 : vector<2x64xf32> to vector<2x64xbf16>
    %cst_56 = arith.constant dense<0.000000e+00> : vector<2x128xf32>
    %295 = tpu.matmul %294, %10, %cst_56 {dimension_numbers = #tpu.dot_dimension_numbers<[1], [0], [0], [1], [0, 0, 1, 1], [], []>} : vector<2x64xbf16>, vector<64x128xbf16>, vector<2x128xf32> -> vector<2x128xf32>
    %296 = vector.broadcast %11 : vector<1x128xf32> to vector<2x128xf32>
    %297 = arith.addf %295, %296 : vector<2x128xf32>
    %298 = vector.extract_strided_slice %297 {offsets = [0, 0], sizes = [2, 96], strides = [1, 1]} : vector<2x128xf32> to vector<2x96xf32>
    %299 = arith.negf %298 : vector<2x96xf32>
    %300 = math.exp %299 : vector<2x96xf32>
    %cst_57 = arith.constant 1.000000e+00 : f32
    %301 = vector.broadcast %cst_57 : f32 to vector<2x96xf32>
    %302 = arith.addf %301, %300 : vector<2x96xf32>
    %303 = arith.divf %301, %302 : vector<2x96xf32>
    %304 = vector.extract_strided_slice %297 {offsets = [0, 96], sizes = [2, 32], strides = [1, 1]} : vector<2x128xf32> to vector<2x32xf32>
    %305 = math.tanh %304 : vector<2x32xf32>
    %306 = vector.extract_strided_slice %303 {offsets = [0, 0], sizes = [2, 32], strides = [1, 1]} : vector<2x96xf32> to vector<2x32xf32>
    %307 = vector.extract_strided_slice %303 {offsets = [0, 32], sizes = [2, 32], strides = [1, 1]} : vector<2x96xf32> to vector<2x32xf32>
    %308 = vector.extract_strided_slice %303 {offsets = [0, 64], sizes = [2, 32], strides = [1, 1]} : vector<2x96xf32> to vector<2x32xf32>
    %309 = arith.mulf %307, %268 : vector<2x32xf32>
    %310 = arith.mulf %306, %305 : vector<2x32xf32>
    %311 = arith.addf %309, %310 : vector<2x32xf32>
    %312 = math.tanh %311 : vector<2x32xf32>
    %313 = arith.mulf %308, %312 : vector<2x32xf32>
    %c7_i32 = arith.constant 7 : i32
    %314 = arith.index_cast %c7_i32 : i32 to index
    %c0_58 = arith.constant 0 : index
    %c0_59 = arith.constant 0 : index
    %315 = vector.load %arg7[%314, %c0_58, %c0_59] : memref<8x2x128xf32, #tpu.memory_space<vmem>>, vector<1x2x128xf32>
    %316 = vector.shape_cast %315 : vector<1x2x128xf32> to vector<2x128xf32>
    %317 = arith.truncf %292 : vector<2x32xf32> to vector<2x32xbf16>
    %cst_60 = arith.constant dense<0.000000e+00> : vector<2x128xf32>
    %318 = tpu.matmul %317, %9, %cst_60 {dimension_numbers = #tpu.dot_dimension_numbers<[1], [0], [0], [1], [0, 0, 1, 1], [], []>} : vector<2x32xbf16>, vector<32x128xbf16>, vector<2x128xf32> -> vector<2x128xf32>
    %319 = arith.addf %316, %318 : vector<2x128xf32>
    %320 = vector.extract_strided_slice %319 {offsets = [0, 0], sizes = [2, 96], strides = [1, 1]} : vector<2x128xf32> to vector<2x96xf32>
    %321 = arith.negf %320 : vector<2x96xf32>
    %322 = math.exp %321 : vector<2x96xf32>
    %cst_61 = arith.constant 1.000000e+00 : f32
    %323 = vector.broadcast %cst_61 : f32 to vector<2x96xf32>
    %324 = arith.addf %323, %322 : vector<2x96xf32>
    %325 = arith.divf %323, %324 : vector<2x96xf32>
    %326 = vector.extract_strided_slice %319 {offsets = [0, 96], sizes = [2, 32], strides = [1, 1]} : vector<2x128xf32> to vector<2x32xf32>
    %327 = math.tanh %326 : vector<2x32xf32>
    %328 = vector.extract_strided_slice %325 {offsets = [0, 0], sizes = [2, 32], strides = [1, 1]} : vector<2x96xf32> to vector<2x32xf32>
    %329 = vector.extract_strided_slice %325 {offsets = [0, 32], sizes = [2, 32], strides = [1, 1]} : vector<2x96xf32> to vector<2x32xf32>
    %330 = vector.extract_strided_slice %325 {offsets = [0, 64], sizes = [2, 32], strides = [1, 1]} : vector<2x96xf32> to vector<2x32xf32>
    %331 = arith.mulf %329, %290 : vector<2x32xf32>
    %332 = arith.mulf %328, %327 : vector<2x32xf32>
    %333 = arith.addf %331, %332 : vector<2x32xf32>
    %334 = math.tanh %333 : vector<2x32xf32>
    %335 = arith.mulf %330, %334 : vector<2x32xf32>
    %336 = tpu.concatenate %335, %313 in 1 : vector<2x32xf32>, vector<2x32xf32> -> vector<2x64xf32>
    %337 = arith.truncf %336 : vector<2x64xf32> to vector<2x64xbf16>
    %cst_62 = arith.constant dense<0.000000e+00> : vector<2x128xf32>
    %338 = tpu.matmul %337, %10, %cst_62 {dimension_numbers = #tpu.dot_dimension_numbers<[1], [0], [0], [1], [0, 0, 1, 1], [], []>} : vector<2x64xbf16>, vector<64x128xbf16>, vector<2x128xf32> -> vector<2x128xf32>
    %339 = vector.broadcast %11 : vector<1x128xf32> to vector<2x128xf32>
    %340 = arith.addf %338, %339 : vector<2x128xf32>
    %341 = vector.extract_strided_slice %340 {offsets = [0, 0], sizes = [2, 96], strides = [1, 1]} : vector<2x128xf32> to vector<2x96xf32>
    %342 = arith.negf %341 : vector<2x96xf32>
    %343 = math.exp %342 : vector<2x96xf32>
    %cst_63 = arith.constant 1.000000e+00 : f32
    %344 = vector.broadcast %cst_63 : f32 to vector<2x96xf32>
    %345 = arith.addf %344, %343 : vector<2x96xf32>
    %346 = arith.divf %344, %345 : vector<2x96xf32>
    %347 = vector.extract_strided_slice %340 {offsets = [0, 96], sizes = [2, 32], strides = [1, 1]} : vector<2x128xf32> to vector<2x32xf32>
    %348 = math.tanh %347 : vector<2x32xf32>
    %349 = vector.extract_strided_slice %346 {offsets = [0, 0], sizes = [2, 32], strides = [1, 1]} : vector<2x96xf32> to vector<2x32xf32>
    %350 = vector.extract_strided_slice %346 {offsets = [0, 32], sizes = [2, 32], strides = [1, 1]} : vector<2x96xf32> to vector<2x32xf32>
    %351 = vector.extract_strided_slice %346 {offsets = [0, 64], sizes = [2, 32], strides = [1, 1]} : vector<2x96xf32> to vector<2x32xf32>
    %352 = arith.mulf %350, %311 : vector<2x32xf32>
    %353 = arith.mulf %349, %348 : vector<2x32xf32>
    %354 = arith.addf %352, %353 : vector<2x32xf32>
    %355 = math.tanh %354 : vector<2x32xf32>
    %356 = arith.mulf %351, %355 : vector<2x32xf32>
    %c8_i32 = arith.constant 8 : i32
    %c0_64 = arith.constant 0 : index
    %c0_65 = arith.constant 0 : index
    %357 = vector.load %arg6[%c0_64, %c0_65] : memref<2x32xf32, #tpu.memory_space<vmem>>, vector<2x32xf32>
    tpu.vector_store %arg6[%c0_64, %c0_65], %356 {strides = array<i32>} : memref<2x32xf32, #tpu.memory_space<vmem>>, vector<2x32xf32>,
    return
  }
}

</mosaic_0001>

<bundles_post_ra>
// kernel: tpu_custom_call.1
= control target key start
LH: loop header
LB: loop body
LE: loop exit
PB: predicated region body
PF: predicated region fallthrough
CT: control target
= control target key end

     0   :  { %11 = vsyncpa [#allocation4], 0  ;;  %s2514_s0 = inlined_call_operand.hbm [shape: bf16[8,2,16], index: 0, kind: input, shape index: {}]   ;;  %s2515_s1 = inlined_call_operand.hbm [shape: bf16[16,128], index: 1, kind: input, shape index: {}]   ;;  %s2516_s2 = inlined_call_operand.hbm [shape: bf16[32,128], index: 2, kind: input, shape index: {}]   ;;  %s2517_s3 = inlined_call_operand.vmem [shape: f32[1,128], index: 3, kind: input, shape index: {}]   ;;  %s2518_s4 = inlined_call_operand.hbm [shape: bf16[64,128], index: 4, kind: input, shape index: {}]   ;;  %s2519_s5 = inlined_call_operand.vmem [shape: f32[1,128], index: 5, kind: input, shape index: {}]   ;;  %s2520_s6 = inlined_call_operand.hbm [shape: f32[2,32], index: 6, kind: output, shape index: {}]  }
   0x1   :  { %12 = vsyncpa [#allocation7], 0 }
   0x2   :  { %13 = vsyncpa [#allocation10], 0 }
   0x3   :  { %14 = vsyncpa [#allocation5], 0  ;;  %s2082_s21 = smov [#allocation6]   ;;  %s1964_s25 = scalar_lea.hbm %s2515_s1, 128 }
   0x4   :  { %s32_s22 = sshll.u32 %s2082_s21, 4  ;;  %p1965_p0 = scmp.ne.s32.totalorder %s2515_s1, %s1964_s25  ;;  %s33_s22 = int_to_ptr.vmem [resolvable:$true] %s32_s22 }
   0x5   :  { %p1968_p1 = scmp.lt.u32.totalorder %s1964_s25, %s2515_s1 }
   0x7   :  { %p1970_p2 = pnand %p1968_p1, %p1965_p0 }
   0x9   :  { %1973 = shalt.err (!%p1970_p2)
}
   0xa   :  { %s1974_s30 = scalar_lea.vmem %s33_s22, 128  ;;  %p1979_p4 = scmp.lt.s32.totalorder %s33_s22, %s33_s22 }
   0xb   :  { %p1975_p3 = scmp.ne.s32.totalorder %s33_s22, %s1974_s30  ;;  %p1980_p5 = scmp.lt.s32.totalorder %s1974_s30, %s1974_s30 }
   0xd   :  { %p1981_p6 = por %p1980_p5, %p1979_p4 }
   0xf   :  { %p1982_p7 = pnand %p1981_p6, %p1975_p3 }
  0x11   :  { %1985 = shalt.err (!%p1982_p7)
}
  0x12   :  { %s2083_s7 = smov 64   ;;  %s2084_s8 = smov 4  }
  0x13   :  { %38 = dma.hbm_to_vmem [thread:$0]  %s2515_s1, 128, %s33_s22, [#allocation7], %s2083_s7, %s2083_s7, %s2084_s8  }
  0x14   :  { %s2085_s11 = smov [#allocation3]   ;;  %s1986_s15 = scalar_lea.hbm %s2514_s0, 128 }
  0x15   :  { %s20_s12 = sshll.u32 %s2085_s11, 4  ;;  %p1987_p8 = scmp.ne.s32.totalorder %s2514_s0, %s1986_s15  ;;  %s21_s12 = int_to_ptr.vmem [resolvable:$true] %s20_s12 }
  0x16   :  { %p1990_p9 = scmp.lt.u32.totalorder %s1986_s15, %s2514_s0 }
  0x18   :  { %p1992_p10 = pnand %p1990_p9, %p1987_p8 }
  0x1a   :  { %1995 = shalt.err (!%p1992_p10)
}
  0x1b   :  { %s1996_s20 = scalar_lea.vmem %s21_s12, 128  ;;  %p2001_p12 = scmp.lt.s32.totalorder %s21_s12, %s21_s12 }
  0x1c   :  { %p1997_p11 = scmp.ne.s32.totalorder %s21_s12, %s1996_s20  ;;  %p2002_p13 = scmp.lt.s32.totalorder %s1996_s20, %s1996_s20 }
  0x1e   :  { %p2003_p0 = por %p2002_p13, %p2001_p12 }
  0x20   :  { %p2004_p1 = pnand %p2003_p0, %p1997_p11 }
  0x22   :  { %2007 = shalt.err (!%p2004_p1)
}
  0x23   :  { %s2086_s1 = smov 16   ;;  %s2087_s21 = smov 1  }
  0x24   :  { %26 = dma.hbm_to_vmem [thread:$0]  %s2514_s0, 128, %s21_s12, [#allocation4], %s2086_s1, %s2086_s1, %s2087_s21  }
  0x25   :  { %s2088_s24 = smov [#allocation8]   ;;  %s2089_s26 = smov [#allocation9]  }
  0x26   :  { %s44_s25 = sshll.u32 %s2088_s24, 4  ;;  %s58_s27 = sshll.u32 %s2089_s26, 4  ;;  %s45_s25 = int_to_ptr.vmem [resolvable:$true] %s44_s25  ;;  %s2160_s27 = int_to_ptr.vmem [resolvable:$true] %s58_s27 }
  0x27   :  { %s2008_s30 = scalar_lea.hbm %s2516_s2, 256 }
  0x28   :  { %p2009_p2 = scmp.ne.s32.totalorder %s2516_s2, %s2008_s30  ;;  %p2012_p3 = scmp.lt.u32.totalorder %s2008_s30, %s2516_s2 }
  0x2a   :  { %p2014_p4 = pnand %p2012_p3, %p2009_p2 }
  0x2c   :  { %2017 = shalt.err (!%p2014_p4)
}
  0x2d   :  { %s2018_s0 = scalar_lea.vmem %s45_s25, 256  ;;  %p2023_p6 = scmp.lt.s32.totalorder %s45_s25, %s45_s25 }
  0x2e   :  { %p2019_p5 = scmp.ne.s32.totalorder %s45_s25, %s2018_s0  ;;  %p2024_p7 = scmp.lt.s32.totalorder %s2018_s0, %s2018_s0 }
  0x30   :  { %p2025_p8 = por %p2024_p7, %p2023_p6 }
  0x32   :  { %p2026_p9 = pnand %p2025_p8, %p2019_p5 }
  0x34   :  { %2029 = shalt.err (!%p2026_p9)
}
  0x35   :  { %50 = dma.hbm_to_vmem [thread:$0]  %s2516_s2, 256, %s45_s25, [#allocation7], %s2083_s7, %s2083_s7, %s2084_s8  }
  0x36   :  { %s2030_s17 = scalar_lea.hbm %s2518_s4, 512 }
  0x37   :  { %p2031_p10 = scmp.ne.s32.totalorder %s2518_s4, %s2030_s17  ;;  %p2034_p11 = scmp.lt.u32.totalorder %s2030_s17, %s2518_s4 }
  0x39   :  { %p2036_p12 = pnand %p2034_p11, %p2031_p10 }
  0x3b   :  { %2039 = shalt.err (!%p2036_p12)
}
  0x3c   :  { %s2040_s21 = scalar_lea.vmem %s2160_s27, 512  ;;  %p2045_p0 = scmp.lt.s32.totalorder %s2160_s27, %s2160_s27 }
  0x3d   :  { %p2041_p13 = scmp.ne.s32.totalorder %s2160_s27, %s2040_s21  ;;  %p2046_p1 = scmp.lt.s32.totalorder %s2040_s21, %s2040_s21 }
  0x3f   :  { %p2047_p2 = por %p2046_p1, %p2045_p0 }
  0x41   :  { %p2048_p3 = pnand %p2047_p2, %p2041_p13 }
  0x43   :  { %2051 = shalt.err (!%p2048_p3)
}
  0x44   :  { %64 = dma.hbm_to_vmem [thread:$0]  %s2518_s4, 512, %s2160_s27, [#allocation10], %s2083_s7, %s2083_s7, %s2084_s8  }
  0x45   :  { %2074 = dma.done.wait [#allocation4], 128  }
  0x46   :  { %2075 = vsyncadd [#allocation4], 4294967168 }
  0x47   :  { %2076 = dma.done.wait [#allocation7], 384  }
  0x48   :  { %2077 = vsyncadd [#allocation7], 4294966912 }
  0x49   :  { %2078 = dma.done.wait [#allocation10], 512  }
  0x4a   :  { %2079 = vsyncadd [#allocation10], 4294966784  ;;  %v112_v0 = vlaneseq  ;;  %v2090_v1 = vmov 0.0   ;;  %vm2091_vm0 = vmmov 0   ;;  %v2092_v2 = vmov 1966171168  }
  0x4b   :  { %1647 = vmatprep.subr.bf16.mxu0 %v2090_v1  ;;  %1649 = vmatprep.mubr.msk.bf16.mxu0 %vm2091_vm0, %v2090_v1  ;;  %v110_v3 = vunpack.c.l.s4 %v2092_v2  ;;  %v1829_v6 = vld [vmem:[#allocation6] sm:$0xff]   ;;  %v80_v8 = vld [vmem:[#allocation3] sm:$0x1]  ;;  %v81_v9 = vld [vmem:[#allocation3 + $0x1] sm:$0x1]  ;;  %vm160_vm1 = vcmask 130048  }
  0x4c   :  { %1673 = vmatprep.subr.bf16.mxu1 %v2090_v1  ;;  %1677 = vmatprep.mubr.msk.bf16.mxu1 %vm2091_vm0, %v2090_v1  ;;  %v113_v5 = vshrl.u32 %v112_v0, 7  ;;  %v82_v10 = vld [vmem:[#allocation3 + $0x2] sm:$0x1]  ;;  %v83_v11 = vld [vmem:[#allocation3 + $0x3] sm:$0x1]  ;;  %v105_v14 = vcombine.low %v80_v8, %v81_v9  ;;  %v2204_v21 = vld [vmem:[#allocation8] sm:$0xff]  }
  0x4d   :  { %v111_v4 = vunpack.c.0.s8 %v110_v3  ;;  %1648 = vmatpush3.bf16.msra.mxu0 %v1829_v6  ;;  %v84_v12 = vld [vmem:[#allocation3 + $0x4] sm:$0x1]  ;;  %v85_v13 = vld [vmem:[#allocation3 + $0x5] sm:$0x1]  ;;  %v86_v15 = vld [vmem:[#allocation3 + $0x6] sm:$0x1]  ;;  %v106_v17 = vcombine.low %v82_v10, %v83_v11  ;;  %1674 = vmatpush3.bf16.msra.mxu1 %v2204_v21 }
  0x4e   :  { %v87_v16 = vld [vmem:[#allocation3 + $0x7] sm:$0x1]  ;;  %v107_v18 = vcombine.low %v84_v12, %v85_v13  ;;  %1653 = vmatprep.subr.bf16.mxu0 %v2090_v1  ;;  %1675 = vmatprep.subr.bf16.mxu1 %v2090_v1  ;;  %v2208_v27 = vld [vmem:[#allocation8 + $0x8] sm:$0xff]   ;;  %v2093_v31 = vmov 0   ;;  %v2094_v32 = vmov 1983009808  }
  0x4f   :  { %v114_v7 = vsub.s32 %v111_v4, %v113_v5  ;;  %v108_v19 = vcombine.low %v86_v15, %v87_v16  ;;  %v209_v33 = vunpack.c.l.s4 %v2094_v32  ;;  %v1536_v35 = vld [vmem:[%s2517_s3] ss:$0 sm:$0xff]  ;;  %s2095_s3 = smov 32   ;;  %v2228_v6 = vld [vmem:[#allocation9] sm:$0xff]   ;;  %v2241_v10 = vld [vmem:[#allocation9 + $0x18] sm:$0xff]   ;;  %vm283_vm2 = vcmask 261120  }
  0x50   :  { %v2235_v8 = vld [vmem:[#allocation9 + $0x10] sm:$0xff]   ;;  %vm388_vm3 = vcmask 523264   ;;  %s2097_s25 = smov [#allocation11]   ;;  %vm1517_vm4 = vcmask 254976  }
  0x51   :  { %v115_v20 = vrot.slane %v105_v14, %v114_v7  ;;  %v122_v22 = vrot.slane %v106_v17, %v114_v7  ;;  %v129_v23 = vrot.slane %v107_v18, %v114_v7  ;;  %v136_v24 = vrot.slane %v108_v19, %v114_v7  ;;  %1676 = vmatpush3.bf16.msra.mxu1 %v2208_v27  ;;  %v2269_v18 = vld [vmem:[%s2519_s5] ss:$0 sm:$0xff]  ;;  %s2096_s5 = smov 96   ;;  %s1525_s26 = sshll.u32 %s2097_s25, 4  ;;  %s1526_s26 = int_to_ptr.vmem [resolvable:$true] %s1525_s26 }
  0x52   :  { %1681 = vmatprep.subr.bf16.mxu1 %v2090_v1  ;;  %v210_v34 = vunpack.c.0.s8 %v209_v33  ;;  %s2052_s27 = scalar_lea.vmem %s1526_s26, 32  ;;  %p2057_p5 = scmp.lt.s32.totalorder %s1526_s26, %s1526_s26 }
  0x53   :  { %v137_v25 = vcombine.low %v115_v20, %v122_v22  ;;  %v138_v26 = vcombine.low %v129_v23, %v136_v24  ;;  %p2053_p4 = scmp.ne.s32.totalorder %s1526_s26, %s2052_s27  ;;  %p2058_p6 = scmp.lt.s32.totalorder %s2052_s27, %s2052_s27 }
  0x54   :  { %v213_v36 = vsub.s32 %v210_v34, %v113_v5 }
  0x55   :  { %v145_v28 = vrot.slane %v137_v25, %v114_v7  ;;  %v152_v29 = vrot.slane %v138_v26, %v114_v7  ;;  %v2231_v7 = vld [vmem:[#allocation9 + $0x8] sm:$0xff]   ;;  %p2059_p7 = por %p2058_p6, %p2057_p5 }
  0x57   :  { %v153_v30 = vcombine.low %v145_v28, %v152_v29  ;;  %p2060_p8 = pnand %p2059_p7, %p2053_p4 }
  0x59   :  { %1650 = vmatmul.mubr.msk.bf16.vlgmr.msra.gmra.mrb[0].mxu0 %vm160_vm1, %v153_v30 }
  0x5a   :  { %1654 = vmatpush3.bf16.msra.mxu0 %v2204_v21  ;;  %1657 = vmatprep.mubr.msk.bf16.mxu0 %vm2091_vm0, %v2090_v1 }
  0x5b   :  { %1655 = vmatprep.subr.bf16.mxu0 %v2090_v1 }
  0x5e   :  { %1656 = vmatpush3.bf16.msra.mxu0 %v2208_v27 }
  0x5f   :  { %1661 = vmatprep.subr.bf16.mxu0 %v2090_v1 }
  0x61   :  { %1658 = vmatmul.mubr.bf16.vlgmr.msra.gmra.mrb[4].mxu0 %v2093_v31 }
  0x62   :  { %1669 = vmatprep.mubr.msk.bf16.mxu0 %vm2091_vm0, %v2090_v1  ;;  %1662 = vmatpush3.bf16.msra.mxu0 %v2228_v6 }
  0x63   :  { %1663 = vmatprep.subr.bf16.mxu0 %v2090_v1 }
  0x66   :  { %1664 = vmatpush3.bf16.msra.mxu0 %v2231_v7 }
  0x67   :  { %1665 = vmatprep.subr.bf16.mxu0 %v2090_v1 }
  0x6a   :  { %1666 = vmatpush3.bf16.msra.mxu0 %v2235_v8 }
  0x6b   :  { %1667 = vmatprep.subr.bf16.mxu0 %v2090_v1 }
  0x6e   :  { %1668 = vmatpush3.bf16.msra.mxu0 %v2241_v10 }
  0x6f   :  { %1693 = vmatprep.subr.bf16.mxu0 %v2090_v1 }
 0x12c   :  { %v198_v37 = vpop.f32.mrb[0].mxu0 }
 0x12d   :  { %v199_v38 = vadd.f32 %v1536_v35, %v198_v37  ;;  %v1651_v39 = vpop.f32.mrb[1].mxu0 }
 0x12e   :  { %v201_v40 = vpop.f32.mrb[2].mxu0 }
 0x12f   :  { %v207_v41 = vcombine.high %v199_v38, %v199_v38  ;;  %v214_v42 = vrot.slane %v199_v38, %v213_v36  ;;  %1539 = vst.sshfl [vmem:[#allocation2] sm:$0x3 pattern:$0x76325410] %v199_v38  ;;  %v202_v43 = vadd.f32 %v1536_v35, %v201_v40  ;;  %v1652_v44 = vpop.f32.mrb[3].mxu0 }
 0x131   :  { %v221_v45 = vrot.slane %v207_v41, %v213_v36  ;;  %v222_v46 = vcombine.high %v214_v42, %v214_v42  ;;  %1540 = vst.sshfl [vmem:[#allocation2 + $0x4] sm:$0x3 pattern:$0x76325410] %v207_v41  ;;  %v224_v47 = vcombine.high %v202_v43, %v202_v43  ;;  %v231_v48 = vrot.slane %v202_v43, %v213_v36 }
 0x132   :  { %1541 = vst.sshfl [vmem:[#allocation2 + $0x8] sm:$0x3 pattern:$0x76325410] %v202_v43 }
 0x133   :  { %v223_v49 = vcombine.high %v221_v45, %v221_v45  ;;  %250 = vst [vmem:[#allocation2 + $0x2] sm:$0x3] %v222_v46  ;;  %v238_v50 = vrot.slane %v224_v47, %v213_v36  ;;  %v239_v51 = vcombine.high %v231_v48, %v231_v48  ;;  %1542 = vst.sshfl [vmem:[#allocation2 + $0xc] sm:$0x3 pattern:$0x76325410] %v224_v47 }
 0x134   :  { %v321_v52 = vpop.f32.mrb[4].mxu0 }
 0x135   :  { %252 = vst [vmem:[#allocation2 + $0x6] sm:$0x3] %v223_v49  ;;  %v240_v53 = vcombine.high %v238_v50, %v238_v50  ;;  %254 = vst [vmem:[#allocation2 + $0xa] sm:$0x3] %v239_v51  ;;  %v1659_v54 = vpop.f32.mrb[5].mxu0 }
 0x136   :  { %v270_v55 = vld [vmem:[#allocation2] sm:$0x3]  ;;  %v324_v56 = vpop.f32.mrb[6].mxu0 }
 0x137   :  { %256 = vst [vmem:[#allocation2 + $0xe] sm:$0x3] %v240_v53  ;;  %v327_v57 = vadd.f32 %v321_v52, %v270_v55  ;;  %v1660_v58 = vpop.f32.mrb[7].mxu0 }
 0x139   :  { %1836 = vtanh.f32 %v327_v57  ;;  %v1545_v60 = vmul.f32 -1.442695, %v327_v57 }
 0x13a   :  { %v457_v19 = vld [vmem:[#allocation2 + $0x2] sm:$0x3] }
 0x13b   :  { %1838 = vpow2.f32 %v1545_v60 }
 0x143   :  { %v1837_v59 = vpop.eup %1836 }
 0x144   :  { %337 = vrot.lane.b32.xlu0 %v1837_v59, %s2095_s3 }
 0x145   :  { %v1839_v61 = vpop.eup %1838 }
 0x146   :  { %v331_v62 = vadd.f32 1.0, %v1839_v61 }
 0x148   :  { %1840 = vrcp.f32 %v331_v62 }
 0x152   :  { %v1841_v63 = vpop.eup %1840 }
 0x153   :  { %v335_v3 = vmul.f32 0.0, %v1841_v63 }
 0x1b6   :  { %v338_v0 = vpop.permute.xlu0 %337 }
 0x1b7   :  { %v340_v2 = vmul.f32 %v1841_v63, %v338_v0 }
 0x1b9   :  { %342 = vrot.lane.b32.xlu0 %v340_v2, %s2095_s3  ;;  %v608_v2 = vld [vmem:[#allocation2 + $0x4] sm:$0x3] }
 0x22b   :  { %v343_v4 = vpop.permute.xlu0 %342 }
 0x22c   :  { %v2225_v5 = vadd.f32 %v343_v4, %v335_v3 }
 0x22e   :  { %1842 = vtanh.f32 %v2225_v5 }
 0x238   :  { %v1843_v9 = vpop.eup %1842 }
 0x239   :  { %348 = vrot.lane.b32.xlu1 %v1843_v9, %s2095_s3 }
 0x2ab   :  { %v349_v11 = vpop.permute.xlu1 %348 }
 0x2ac   :  { %v351_v12 = vmul.f32 %v1841_v63, %v349_v11 }
 0x2ae   :  { %353 = vrot.lane.b32.xlu1 %v351_v12, %s2083_s7  ;;  %v458_v13 = vpack.c.bf16 %v351_v12, %v351_v12 }
 0x2b0   :  { %460 = vrot.lane.b32.xlu0 %v458_v13, %s2083_s7 }
 0x320   :  { %v354_v14 = vpop.permute.xlu1 %353 }
 0x321   :  { %v356_v15 = vsel %vm283_vm2, %v354_v14, 0.0 }
 0x322   :  { %v357_v16 = vpack.c.bf16 %v356_v15, %v356_v15  ;;  %v461_v17 = vpop.permute.xlu0 %460 }
 0x323   :  { %1678 = vmatmul.mubr.msk.bf16.vlgmr.msra.gmra.mrb[0].mxu1 %vm283_vm2, %v461_v17 }
 0x324   :  { %1670 = vmatmul.mubr.msk.bf16.vlgmr.msra.gmra.mrb[8].mxu0 %vm388_vm3, %v357_v16  ;;  %1682 = vmatpush3.bf16.msra.mxu1 %v2228_v6 }
 0x325   :  { %1683 = vmatprep.subr.bf16.mxu1 %v2090_v1  ;;  %1694 = vmatpush3.bf16.msra.mxu0 %v2204_v21 }
 0x326   :  { %1695 = vmatprep.subr.bf16.mxu0 %v2090_v1  ;;  %1689 = vmatprep.mubr.msk.bf16.mxu1 %vm2091_vm0, %v2090_v1 }
 0x327   :  { %1697 = vmatprep.mubr.msk.bf16.mxu0 %vm2091_vm0, %v2090_v1 }
 0x328   :  { %1684 = vmatpush3.bf16.msra.mxu1 %v2231_v7 }
 0x329   :  { %1685 = vmatprep.subr.bf16.mxu1 %v2090_v1  ;;  %1696 = vmatpush3.bf16.msra.mxu0 %v2208_v27 }
 0x32a   :  { %1701 = vmatprep.subr.bf16.mxu0 %v2090_v1 }
 0x32c   :  { %1686 = vmatpush3.bf16.msra.mxu1 %v2235_v8 }
 0x32d   :  { %1687 = vmatprep.subr.bf16.mxu1 %v2090_v1 }
 0x330   :  { %1688 = vmatpush3.bf16.msra.mxu1 %v2241_v10 }
 0x331   :  { %1713 = vmatprep.subr.bf16.mxu1 %v2090_v1 }
 0x3f6   :  { %v499_v20 = vpop.f32.mrb[0].mxu1 }
 0x3f7   :  { %v505_v22 = vadd.f32 %v499_v20, %v457_v19  ;;  %v426_v23 = vpop.f32.mrb[8].mxu0  ;;  %v1679_v24 = vpop.f32.mrb[1].mxu1 }
 0x3f8   :  { %v427_v25 = vadd.f32 %v2269_v18, %v426_v23  ;;  %v1671_v26 = vpop.f32.mrb[9].mxu0  ;;  %v502_v28 = vpop.f32.mrb[2].mxu1 }
 0x3f9   :  { %1844 = vtanh.f32 %v505_v22  ;;  %v429_v29 = vpop.f32.mrb[10].mxu0  ;;  %v1680_v30 = vpop.f32.mrb[3].mxu1  ;;  %v1554_v34 = vmul.f32 -1.442695, %v505_v22 }
 0x3fa   :  { %1846 = vtanh.f32 %v427_v25  ;;  %v1672_v31 = vpop.f32.mrb[11].mxu0  ;;  %v1552_v35 = vmul.f32 -1.442695, %v427_v25 }
 0x3fb   :  { %1848 = vpow2.f32 %v1554_v34 }
 0x3fc   :  { %1850 = vpow2.f32 %v1552_v35 }
 0x403   :  { %v1845_v32 = vpop.eup %1844 }
 0x404   :  { %v1847_v33 = vpop.eup %1846  ;;  %515 = vrot.lane.b32.xlu0 %v1845_v32, %s2095_s3 }
 0x405   :  { %441 = vrot.lane.b32.xlu1 %v1847_v33, %s2095_s3  ;;  %v1849_v36 = vpop.eup %1848 }
 0x406   :  { %v1851_v37 = vpop.eup %1850  ;;  %v509_v38 = vadd.f32 1.0, %v1849_v36 }
 0x407   :  { %v435_v39 = vadd.f32 1.0, %v1851_v37 }
 0x408   :  { %1852 = vrcp.f32 %v509_v38 }
 0x409   :  { %1854 = vrcp.f32 %v435_v39 }
 0x412   :  { %v1853_v40 = vpop.eup %1852 }
 0x413   :  { %v1855_v42 = vpop.eup %1854  ;;  %v513_v46 = vmul.f32 %v1853_v40, %v2225_v5 }
 0x414   :  { %v439_v48 = vmul.f32 0.0, %v1855_v42 }
 0x476   :  { %v516_v41 = vpop.permute.xlu0 %515 }
 0x477   :  { %v518_v43 = vmul.f32 %v1853_v40, %v516_v41  ;;  %v442_v44 = vpop.permute.xlu1 %441 }
 0x478   :  { %v444_v45 = vmul.f32 %v1855_v42, %v442_v44 }
 0x479   :  { %520 = vrot.lane.b32.xlu0 %v518_v43, %s2095_s3 }
 0x47a   :  { %446 = vrot.lane.b32.xlu1 %v444_v45, %s2095_s3 }
 0x4eb   :  { %v521_v47 = vpop.permute.xlu0 %520 }
 0x4ec   :  { %v2277_v49 = vadd.f32 %v521_v47, %v513_v46  ;;  %v447_v50 = vpop.permute.xlu1 %446 }
 0x4ed   :  { %v2279_v51 = vadd.f32 %v447_v50, %v439_v48 }
 0x4ee   :  { %1856 = vtanh.f32 %v2277_v49 }
 0x4ef   :  { %1858 = vtanh.f32 %v2279_v51 }
 0x4f8   :  { %v1857_v52 = vpop.eup %1856 }
 0x4f9   :  { %v1859_v53 = vpop.eup %1858  ;;  %526 = vrot.lane.b32.xlu0 %v1857_v52, %s2095_s3 }
 0x4fa   :  { %452 = vrot.lane.b32.xlu1 %v1859_v53, %s2095_s3 }
 0x56b   :  { %v527_v54 = vpop.permute.xlu0 %526 }
 0x56c   :  { %v529_v55 = vmul.f32 %v1853_v40, %v527_v54  ;;  %v453_v56 = vpop.permute.xlu1 %452  ;;  %v759_v54 = vld [vmem:[#allocation2 + $0x6] sm:$0x3] }
 0x56d   :  { %v455_v57 = vmul.f32 %v1855_v42, %v453_v56 }
 0x56e   :  { %531 = vrot.lane.b32.xlu1 %v529_v55, %s2083_s7  ;;  %v609_v58 = vpack.c.bf16 %v529_v55, %v529_v55 }
 0x56f   :  { %535 = vrot.lane.b32.xlu0 %v455_v57, %s2096_s5 }
 0x572   :  { %611 = vrot.lane.b32.xlu1 %v609_v58, %s2083_s7 }
 0x5e0   :  { %v532_v59 = vpop.permute.xlu1 %531 }
 0x5e1   :  { %v536_v60 = vpop.permute.xlu0 %535 }
 0x5e2   :  { %v538_v61 = vsel %vm283_vm2, %v532_v59, %v536_v60 }
 0x5e3   :  { %v539_v62 = vpack.c.bf16 %v538_v61, %v538_v61 }
 0x5e4   :  { %v612_v63 = vpop.permute.xlu1 %611 }
 0x5e5   :  { %1690 = vmatmul.mubr.msk.bf16.vlgmr.msra.gmra.mrb[4].mxu1 %vm388_vm3, %v539_v62  ;;  %1698 = vmatmul.mubr.msk.bf16.vlgmr.msra.gmra.mrb[12].mxu0 %vm283_vm2, %v612_v63 }
 0x5e6   :  { %1702 = vmatpush3.bf16.msra.mxu0 %v2228_v6  ;;  %1714 = vmatpush3.bf16.msra.mxu1 %v2204_v21 }
 0x5e7   :  { %1703 = vmatprep.subr.bf16.mxu0 %v2090_v1  ;;  %1715 = vmatprep.subr.bf16.mxu1 %v2090_v1 }
 0x5e8   :  { %1709 = vmatprep.mubr.msk.bf16.mxu0 %vm2091_vm0, %v2090_v1  ;;  %1717 = vmatprep.mubr.msk.bf16.mxu1 %vm2091_vm0, %v2090_v1 }
 0x5ea   :  { %1704 = vmatpush3.bf16.msra.mxu0 %v2231_v7  ;;  %1716 = vmatpush3.bf16.msra.mxu1 %v2208_v27 }
 0x5eb   :  { %1705 = vmatprep.subr.bf16.mxu0 %v2090_v1  ;;  %1721 = vmatprep.subr.bf16.mxu1 %v2090_v1 }
 0x5ee   :  { %1706 = vmatpush3.bf16.msra.mxu0 %v2235_v8 }
 0x5ef   :  { %1707 = vmatprep.subr.bf16.mxu0 %v2090_v1 }
 0x5f2   :  { %1708 = vmatpush3.bf16.msra.mxu0 %v2241_v10 }
 0x5f3   :  { %1733 = vmatprep.subr.bf16.mxu0 %v2090_v1 }
 0x6b8   :  { %v577_v0 = vpop.f32.mrb[4].mxu1  ;;  %v650_v3 = vpop.f32.mrb[12].mxu0 }
 0x6b9   :  { %v578_v4 = vadd.f32 %v2269_v18, %v577_v0  ;;  %v656_v5 = vadd.f32 %v650_v3, %v608_v2  ;;  %v1691_v9 = vpop.f32.mrb[5].mxu1  ;;  %v1699_v11 = vpop.f32.mrb[13].mxu0 }
 0x6ba   :  { %v580_v12 = vpop.f32.mrb[6].mxu1  ;;  %v653_v13 = vpop.f32.mrb[14].mxu0 }
 0x6bb   :  { %1860 = vtanh.f32 %v578_v4  ;;  %v1692_v14 = vpop.f32.mrb[7].mxu1  ;;  %v1700_v15 = vpop.f32.mrb[15].mxu0  ;;  %v1556_v19 = vmul.f32 -1.442695, %v578_v4  ;;  %v1558_v20 = vmul.f32 -1.442695, %v656_v5 }
 0x6bc   :  { %1862 = vtanh.f32 %v656_v5 }
 0x6bd   :  { %1864 = vpow2.f32 %v1556_v19 }
 0x6be   :  { %1866 = vpow2.f32 %v1558_v20 }
 0x6c5   :  { %v1861_v16 = vpop.eup %1860 }
 0x6c6   :  { %v1863_v17 = vpop.eup %1862  ;;  %592 = vrot.lane.b32.xlu0 %v1861_v16, %s2095_s3 }
 0x6c7   :  { %666 = vrot.lane.b32.xlu1 %v1863_v17, %s2095_s3  ;;  %v1865_v22 = vpop.eup %1864 }
 0x6c8   :  { %v1867_v23 = vpop.eup %1866  ;;  %v586_v24 = vadd.f32 1.0, %v1865_v22 }
 0x6c9   :  { %v660_v25 = vadd.f32 1.0, %v1867_v23 }
 0x6ca   :  { %1868 = vrcp.f32 %v586_v24 }
 0x6cb   :  { %1870 = vrcp.f32 %v660_v25 }
 0x6d4   :  { %v1869_v26 = vpop.eup %1868 }
 0x6d5   :  { %v1871_v29 = vpop.eup %1870  ;;  %v590_v33 = vmul.f32 %v1869_v26, %v2279_v51 }
 0x6d6   :  { %v664_v35 = vmul.f32 %v1871_v29, %v2277_v49 }
 0x738   :  { %v593_v28 = vpop.permute.xlu0 %592 }
 0x739   :  { %v595_v30 = vmul.f32 %v1869_v26, %v593_v28  ;;  %v667_v31 = vpop.permute.xlu1 %666 }
 0x73a   :  { %v669_v32 = vmul.f32 %v1871_v29, %v667_v31 }
 0x73b   :  { %597 = vrot.lane.b32.xlu0 %v595_v30, %s2095_s3 }
 0x73c   :  { %671 = vrot.lane.b32.xlu1 %v669_v32, %s2095_s3 }
 0x7ad   :  { %v598_v34 = vpop.permute.xlu0 %597 }
 0x7ae   :  { %v2314_v36 = vadd.f32 %v598_v34, %v590_v33  ;;  %v672_v37 = vpop.permute.xlu1 %671 }
 0x7af   :  { %v2316_v38 = vadd.f32 %v672_v37, %v664_v35 }
 0x7b0   :  { %1872 = vtanh.f32 %v2314_v36 }
 0x7b1   :  { %1874 = vtanh.f32 %v2316_v38 }
 0x7ba   :  { %v1873_v39 = vpop.eup %1872 }
 0x7bb   :  { %v1875_v40 = vpop.eup %1874  ;;  %603 = vrot.lane.b32.xlu0 %v1873_v39, %s2095_s3 }
 0x7bc   :  { %677 = vrot.lane.b32.xlu1 %v1875_v40, %s2095_s3 }
 0x82d   :  { %v604_v41 = vpop.permute.xlu0 %603 }
 0x82e   :  { %v606_v42 = vmul.f32 %v1869_v26, %v604_v41  ;;  %v678_v43 = vpop.permute.xlu1 %677  ;;  %v910_v41 = vld [vmem:[#allocation2 + $0x8] sm:$0x3] }
 0x82f   :  { %v680_v44 = vmul.f32 %v1871_v29, %v678_v43 }
 0x830   :  { %686 = vrot.lane.b32.xlu1 %v606_v42, %s2096_s5 }
 0x831   :  { %682 = vrot.lane.b32.xlu0 %v680_v44, %s2083_s7  ;;  %v760_v45 = vpack.c.bf16 %v680_v44, %v680_v44 }
 0x835   :  { %762 = vrot.lane.b32.xlu0 %v760_v45, %s2083_s7 }
 0x8a2   :  { %v687_v46 = vpop.permute.xlu1 %686 }
 0x8a3   :  { %v683_v47 = vpop.permute.xlu0 %682 }
 0x8a4   :  { %v689_v48 = vsel %vm283_vm2, %v683_v47, %v687_v46 }
 0x8a5   :  { %v690_v49 = vpack.c.bf16 %v689_v48, %v689_v48 }
 0x8a7   :  { %v763_v50 = vpop.permute.xlu0 %762  ;;  %1710 = vmatmul.mubr.msk.bf16.vlgmr.msra.gmra.mrb[16].mxu0 %vm388_vm3, %v690_v49 }
 0x8a8   :  { %1718 = vmatmul.mubr.msk.bf16.vlgmr.msra.gmra.mrb[8].mxu1 %vm283_vm2, %v763_v50  ;;  %1734 = vmatpush3.bf16.msra.mxu0 %v2204_v21 }
 0x8a9   :  { %1722 = vmatpush3.bf16.msra.mxu1 %v2228_v6  ;;  %1735 = vmatprep.subr.bf16.mxu0 %v2090_v1 }
 0x8aa   :  { %1723 = vmatprep.subr.bf16.mxu1 %v2090_v1  ;;  %1729 = vmatprep.mubr.msk.bf16.mxu1 %vm2091_vm0, %v2090_v1 }
 0x8ab   :  { %1737 = vmatprep.mubr.msk.bf16.mxu0 %vm2091_vm0, %v2090_v1 }
 0x8ac   :  { %1736 = vmatpush3.bf16.msra.mxu0 %v2208_v27 }
 0x8ad   :  { %1724 = vmatpush3.bf16.msra.mxu1 %v2231_v7  ;;  %1741 = vmatprep.subr.bf16.mxu0 %v2090_v1 }
 0x8ae   :  { %1725 = vmatprep.subr.bf16.mxu1 %v2090_v1 }
 0x8b1   :  { %1726 = vmatpush3.bf16.msra.mxu1 %v2235_v8 }
 0x8b2   :  { %1727 = vmatprep.subr.bf16.mxu1 %v2090_v1 }
 0x8b5   :  { %1728 = vmatpush3.bf16.msra.mxu1 %v2241_v10 }
 0x8b6   :  { %1753 = vmatprep.subr.bf16.mxu1 %v2090_v1 }
 0x97a   :  { %v728_v51 = vpop.f32.mrb[16].mxu0 }
 0x97b   :  { %v729_v52 = vadd.f32 %v2269_v18, %v728_v51  ;;  %v1711_v53 = vpop.f32.mrb[17].mxu0  ;;  %v801_v55 = vpop.f32.mrb[8].mxu1 }
 0x97c   :  { %v807_v56 = vadd.f32 %v801_v55, %v759_v54  ;;  %v731_v57 = vpop.f32.mrb[18].mxu0  ;;  %v1719_v58 = vpop.f32.mrb[9].mxu1 }
 0x97d   :  { %1876 = vtanh.f32 %v729_v52  ;;  %v1712_v59 = vpop.f32.mrb[19].mxu0  ;;  %v804_v60 = vpop.f32.mrb[10].mxu1  ;;  %v1560_v0 = vmul.f32 -1.442695, %v729_v52 }
 0x97e   :  { %1878 = vtanh.f32 %v807_v56  ;;  %v1720_v61 = vpop.f32.mrb[11].mxu1  ;;  %v1562_v2 = vmul.f32 -1.442695, %v807_v56 }
 0x97f   :  { %1880 = vpow2.f32 %v1560_v0 }
 0x980   :  { %1882 = vpow2.f32 %v1562_v2 }
 0x987   :  { %v1877_v62 = vpop.eup %1876 }
 0x988   :  { %v1879_v63 = vpop.eup %1878  ;;  %743 = vrot.lane.b32.xlu1 %v1877_v62, %s2095_s3 }
 0x989   :  { %817 = vrot.lane.b32.xlu0 %v1879_v63, %s2095_s3  ;;  %v1881_v3 = vpop.eup %1880 }
 0x98a   :  { %v1883_v4 = vpop.eup %1882  ;;  %v737_v5 = vadd.f32 1.0, %v1881_v3 }
 0x98b   :  { %v811_v9 = vadd.f32 1.0, %v1883_v4 }
 0x98c   :  { %1884 = vrcp.f32 %v737_v5 }
 0x98d   :  { %1886 = vrcp.f32 %v811_v9 }
 0x996   :  { %v1885_v11 = vpop.eup %1884 }
 0x997   :  { %v1887_v13 = vpop.eup %1886  ;;  %v741_v17 = vmul.f32 %v1885_v11, %v2314_v36 }
 0x998   :  { %v815_v20 = vmul.f32 %v1887_v13, %v2316_v38 }
 0x9fa   :  { %v744_v12 = vpop.permute.xlu1 %743 }
 0x9fb   :  { %v746_v14 = vmul.f32 %v1885_v11, %v744_v12  ;;  %v818_v15 = vpop.permute.xlu0 %817 }
 0x9fc   :  { %v820_v16 = vmul.f32 %v1887_v13, %v818_v15 }
 0x9fd   :  { %748 = vrot.lane.b32.xlu1 %v746_v14, %s2095_s3 }
 0x9fe   :  { %822 = vrot.lane.b32.xlu0 %v820_v16, %s2095_s3 }
 0xa6f   :  { %v749_v19 = vpop.permute.xlu1 %748 }
 0xa70   :  { %v2351_v22 = vadd.f32 %v749_v19, %v741_v17  ;;  %v823_v23 = vpop.permute.xlu0 %822 }
 0xa71   :  { %v2353_v24 = vadd.f32 %v823_v23, %v815_v20 }
 0xa72   :  { %1888 = vtanh.f32 %v2351_v22 }
 0xa73   :  { %1890 = vtanh.f32 %v2353_v24 }
 0xa7c   :  { %v1889_v25 = vpop.eup %1888 }
 0xa7d   :  { %v1891_v26 = vpop.eup %1890  ;;  %754 = vrot.lane.b32.xlu1 %v1889_v25, %s2095_s3 }
 0xa7e   :  { %828 = vrot.lane.b32.xlu0 %v1891_v26, %s2095_s3 }
 0xaef   :  { %v755_v28 = vpop.permute.xlu1 %754 }
 0xaf0   :  { %v757_v29 = vmul.f32 %v1885_v11, %v755_v28  ;;  %v829_v30 = vpop.permute.xlu0 %828  ;;  %v1061_v28 = vld [vmem:[#allocation2 + $0xa] sm:$0x3] }
 0xaf1   :  { %v831_v31 = vmul.f32 %v1887_v13, %v829_v30 }
 0xaf2   :  { %837 = vrot.lane.b32.xlu0 %v757_v29, %s2096_s5 }
 0xaf3   :  { %833 = vrot.lane.b32.xlu1 %v831_v31, %s2083_s7  ;;  %v911_v32 = vpack.c.bf16 %v831_v31, %v831_v31 }
 0xaf7   :  { %913 = vrot.lane.b32.xlu1 %v911_v32, %s2083_s7 }
 0xb64   :  { %v838_v33 = vpop.permute.xlu0 %837 }
 0xb65   :  { %v834_v34 = vpop.permute.xlu1 %833 }
 0xb66   :  { %v840_v35 = vsel %vm283_vm2, %v834_v34, %v838_v33 }
 0xb67   :  { %v841_v36 = vpack.c.bf16 %v840_v35, %v840_v35 }
 0xb69   :  { %1730 = vmatmul.mubr.msk.bf16.vlgmr.msra.gmra.mrb[12].mxu1 %vm388_vm3, %v841_v36  ;;  %v914_v37 = vpop.permute.xlu1 %913 }
 0xb6a   :  { %1738 = vmatmul.mubr.msk.bf16.vlgmr.msra.gmra.mrb[20].mxu0 %vm283_vm2, %v914_v37  ;;  %1754 = vmatpush3.bf16.msra.mxu1 %v2204_v21 }
 0xb6b   :  { %1742 = vmatpush3.bf16.msra.mxu0 %v2228_v6  ;;  %1755 = vmatprep.subr.bf16.mxu1 %v2090_v1 }
 0xb6c   :  { %1743 = vmatprep.subr.bf16.mxu0 %v2090_v1  ;;  %1749 = vmatprep.mubr.msk.bf16.mxu0 %vm2091_vm0, %v2090_v1 }
 0xb6d   :  { %1757 = vmatprep.mubr.msk.bf16.mxu1 %vm2091_vm0, %v2090_v1 }
 0xb6e   :  { %1756 = vmatpush3.bf16.msra.mxu1 %v2208_v27 }
 0xb6f   :  { %1744 = vmatpush3.bf16.msra.mxu0 %v2231_v7  ;;  %1761 = vmatprep.subr.bf16.mxu1 %v2090_v1 }
 0xb70   :  { %1745 = vmatprep.subr.bf16.mxu0 %v2090_v1 }
 0xb73   :  { %1746 = vmatpush3.bf16.msra.mxu0 %v2235_v8 }
 0xb74   :  { %1747 = vmatprep.subr.bf16.mxu0 %v2090_v1 }
 0xb77   :  { %1748 = vmatpush3.bf16.msra.mxu0 %v2241_v10 }
 0xb78   :  { %1773 = vmatprep.subr.bf16.mxu0 %v2090_v1 }
 0xc3c   :  { %v879_v38 = vpop.f32.mrb[12].mxu1 }
 0xc3d   :  { %v880_v39 = vadd.f32 %v2269_v18, %v879_v38  ;;  %v1731_v40 = vpop.f32.mrb[13].mxu1  ;;  %v952_v42 = vpop.f32.mrb[20].mxu0 }
 0xc3e   :  { %v958_v43 = vadd.f32 %v952_v42, %v910_v41  ;;  %v882_v44 = vpop.f32.mrb[14].mxu1  ;;  %v1739_v45 = vpop.f32.mrb[21].mxu0 }
 0xc3f   :  { %1892 = vtanh.f32 %v880_v39  ;;  %v1732_v46 = vpop.f32.mrb[15].mxu1  ;;  %v955_v47 = vpop.f32.mrb[22].mxu0  ;;  %v1564_v51 = vmul.f32 -1.442695, %v880_v39 }
 0xc40   :  { %1894 = vtanh.f32 %v958_v43  ;;  %v1740_v48 = vpop.f32.mrb[23].mxu0  ;;  %v1566_v52 = vmul.f32 -1.442695, %v958_v43 }
 0xc41   :  { %1896 = vpow2.f32 %v1564_v51 }
 0xc42   :  { %1898 = vpow2.f32 %v1566_v52 }
 0xc49   :  { %v1893_v49 = vpop.eup %1892 }
 0xc4a   :  { %v1895_v50 = vpop.eup %1894  ;;  %894 = vrot.lane.b32.xlu0 %v1893_v49, %s2095_s3 }
 0xc4b   :  { %968 = vrot.lane.b32.xlu1 %v1895_v50, %s2095_s3  ;;  %v1897_v53 = vpop.eup %1896 }
 0xc4c   :  { %v1899_v54 = vpop.eup %1898  ;;  %v888_v55 = vadd.f32 1.0, %v1897_v53 }
 0xc4d   :  { %v962_v56 = vadd.f32 1.0, %v1899_v54 }
 0xc4e   :  { %1900 = vrcp.f32 %v888_v55 }
 0xc4f   :  { %1902 = vrcp.f32 %v962_v56 }
 0xc58   :  { %v1901_v57 = vpop.eup %1900 }
 0xc59   :  { %v1903_v59 = vpop.eup %1902  ;;  %v892_v63 = vmul.f32 %v1901_v57, %v2351_v22 }
 0xc5a   :  { %v966_v2 = vmul.f32 %v1903_v59, %v2353_v24 }
 0xcbc   :  { %v895_v58 = vpop.permute.xlu0 %894 }
 0xcbd   :  { %v897_v60 = vmul.f32 %v1901_v57, %v895_v58  ;;  %v969_v61 = vpop.permute.xlu1 %968 }
 0xcbe   :  { %v971_v62 = vmul.f32 %v1903_v59, %v969_v61 }
 0xcbf   :  { %899 = vrot.lane.b32.xlu0 %v897_v60, %s2095_s3 }
 0xcc0   :  { %973 = vrot.lane.b32.xlu1 %v971_v62, %s2095_s3 }
 0xd31   :  { %v900_v0 = vpop.permute.xlu0 %899 }
 0xd32   :  { %v2388_v3 = vadd.f32 %v900_v0, %v892_v63  ;;  %v974_v4 = vpop.permute.xlu1 %973 }
 0xd33   :  { %v2390_v5 = vadd.f32 %v974_v4, %v966_v2 }
 0xd34   :  { %1904 = vtanh.f32 %v2388_v3 }
 0xd35   :  { %1906 = vtanh.f32 %v2390_v5 }
 0xd3e   :  { %v1905_v9 = vpop.eup %1904 }
 0xd3f   :  { %v1907_v11 = vpop.eup %1906  ;;  %905 = vrot.lane.b32.xlu0 %v1905_v9, %s2095_s3 }
 0xd40   :  { %979 = vrot.lane.b32.xlu1 %v1907_v11, %s2095_s3  ;;  %v1212_v11 = vld [vmem:[#allocation2 + $0xc] sm:$0x3] }
 0xdb1   :  { %v906_v12 = vpop.permute.xlu0 %905 }
 0xdb2   :  { %v908_v13 = vmul.f32 %v1901_v57, %v906_v12  ;;  %v980_v14 = vpop.permute.xlu1 %979 }
 0xdb3   :  { %v982_v15 = vmul.f32 %v1903_v59, %v980_v14 }
 0xdb4   :  { %988 = vrot.lane.b32.xlu1 %v908_v13, %s2096_s5 }
 0xdb5   :  { %984 = vrot.lane.b32.xlu0 %v982_v15, %s2083_s7  ;;  %v1062_v16 = vpack.c.bf16 %v982_v15, %v982_v15 }
 0xdb9   :  { %1064 = vrot.lane.b32.xlu0 %v1062_v16, %s2083_s7 }
 0xe26   :  { %v989_v17 = vpop.permute.xlu1 %988 }
 0xe27   :  { %v985_v19 = vpop.permute.xlu0 %984 }
 0xe28   :  { %v991_v20 = vsel %vm283_vm2, %v985_v19, %v989_v17 }
 0xe29   :  { %v992_v22 = vpack.c.bf16 %v991_v20, %v991_v20 }
 0xe2b   :  { %v1065_v23 = vpop.permute.xlu0 %1064  ;;  %1750 = vmatmul.mubr.msk.bf16.vlgmr.msra.gmra.mrb[24].mxu0 %vm388_vm3, %v992_v22 }
 0xe2c   :  { %1758 = vmatmul.mubr.msk.bf16.vlgmr.msra.gmra.mrb[16].mxu1 %vm283_vm2, %v1065_v23  ;;  %1774 = vmatpush3.bf16.msra.mxu0 %v2204_v21 }
 0xe2d   :  { %1762 = vmatpush3.bf16.msra.mxu1 %v2228_v6  ;;  %1775 = vmatprep.subr.bf16.mxu0 %v2090_v1 }
 0xe2e   :  { %1763 = vmatprep.subr.bf16.mxu1 %v2090_v1  ;;  %1769 = vmatprep.mubr.msk.bf16.mxu1 %vm2091_vm0, %v2090_v1 }
 0xe2f   :  { %1777 = vmatprep.mubr.msk.bf16.mxu0 %vm2091_vm0, %v2090_v1 }
 0xe30   :  { %1776 = vmatpush3.bf16.msra.mxu0 %v2208_v27 }
 0xe31   :  { %1764 = vmatpush3.bf16.msra.mxu1 %v2231_v7  ;;  %1781 = vmatprep.subr.bf16.mxu0 %v2090_v1 }
 0xe32   :  { %1765 = vmatprep.subr.bf16.mxu1 %v2090_v1 }
 0xe35   :  { %1766 = vmatpush3.bf16.msra.mxu1 %v2235_v8 }
 0xe36   :  { %1767 = vmatprep.subr.bf16.mxu1 %v2090_v1 }
 0xe39   :  { %1768 = vmatpush3.bf16.msra.mxu1 %v2241_v10 }
 0xe3a   :  { %1793 = vmatprep.subr.bf16.mxu1 %v2090_v1 }
 0xefe   :  { %v1030_v24 = vpop.f32.mrb[24].mxu0 }
 0xeff   :  { %v1031_v25 = vadd.f32 %v2269_v18, %v1030_v24  ;;  %v1751_v26 = vpop.f32.mrb[25].mxu0  ;;  %v1103_v29 = vpop.f32.mrb[16].mxu1 }
 0xf00   :  { %v1109_v30 = vadd.f32 %v1103_v29, %v1061_v28  ;;  %v1033_v31 = vpop.f32.mrb[26].mxu0  ;;  %v1759_v32 = vpop.f32.mrb[17].mxu1 }
 0xf01   :  { %1908 = vtanh.f32 %v1031_v25  ;;  %v1752_v33 = vpop.f32.mrb[27].mxu0  ;;  %v1106_v34 = vpop.f32.mrb[18].mxu1  ;;  %v1568_v38 = vmul.f32 -1.442695, %v1031_v25 }
 0xf02   :  { %1910 = vtanh.f32 %v1109_v30  ;;  %v1760_v35 = vpop.f32.mrb[19].mxu1  ;;  %v1570_v39 = vmul.f32 -1.442695, %v1109_v30 }
 0xf03   :  { %1912 = vpow2.f32 %v1568_v38 }
 0xf04   :  { %1914 = vpow2.f32 %v1570_v39 }
 0xf0b   :  { %v1909_v36 = vpop.eup %1908 }
 0xf0c   :  { %v1911_v37 = vpop.eup %1910  ;;  %1045 = vrot.lane.b32.xlu1 %v1909_v36, %s2095_s3 }
 0xf0d   :  { %1119 = vrot.lane.b32.xlu0 %v1911_v37, %s2095_s3  ;;  %v1913_v40 = vpop.eup %1912 }
 0xf0e   :  { %v1915_v41 = vpop.eup %1914  ;;  %v1039_v42 = vadd.f32 1.0, %v1913_v40 }
 0xf0f   :  { %v1113_v43 = vadd.f32 1.0, %v1915_v41 }
 0xf10   :  { %1916 = vrcp.f32 %v1039_v42 }
 0xf11   :  { %1918 = vrcp.f32 %v1113_v43 }
 0xf1a   :  { %v1917_v44 = vpop.eup %1916 }
 0xf1b   :  { %v1919_v46 = vpop.eup %1918  ;;  %v1043_v50 = vmul.f32 %v1917_v44, %v2388_v3 }
 0xf1c   :  { %v1117_v52 = vmul.f32 %v1919_v46, %v2390_v5 }
 0xf7e   :  { %v1046_v45 = vpop.permute.xlu1 %1045 }
 0xf7f   :  { %v1048_v47 = vmul.f32 %v1917_v44, %v1046_v45  ;;  %v1120_v48 = vpop.permute.xlu0 %1119 }
 0xf80   :  { %v1122_v49 = vmul.f32 %v1919_v46, %v1120_v48 }
 0xf81   :  { %1050 = vrot.lane.b32.xlu1 %v1048_v47, %s2095_s3 }
 0xf82   :  { %1124 = vrot.lane.b32.xlu0 %v1122_v49, %s2095_s3 }
 0xff3   :  { %v1051_v51 = vpop.permute.xlu1 %1050 }
 0xff4   :  { %v2425_v53 = vadd.f32 %v1051_v51, %v1043_v50  ;;  %v1125_v54 = vpop.permute.xlu0 %1124 }
 0xff5   :  { %v2427_v55 = vadd.f32 %v1125_v54, %v1117_v52 }
 0xff6   :  { %1920 = vtanh.f32 %v2425_v53 }
 0xff7   :  { %1922 = vtanh.f32 %v2427_v55 }
0x1000   :  { %v1921_v56 = vpop.eup %1920 }
0x1001   :  { %v1923_v57 = vpop.eup %1922  ;;  %1056 = vrot.lane.b32.xlu1 %v1921_v56, %s2095_s3 }
0x1002   :  { %1130 = vrot.lane.b32.xlu0 %v1923_v57, %s2095_s3 }
0x1073   :  { %v1057_v58 = vpop.permute.xlu1 %1056 }
0x1074   :  { %v1059_v59 = vmul.f32 %v1917_v44, %v1057_v58  ;;  %v1131_v60 = vpop.permute.xlu0 %1130 }
0x1075   :  { %v1133_v61 = vmul.f32 %v1919_v46, %v1131_v60 }
0x1076   :  { %1139 = vrot.lane.b32.xlu0 %v1059_v59, %s2096_s5 }
0x1077   :  { %1135 = vrot.lane.b32.xlu1 %v1133_v61, %s2083_s7  ;;  %v1213_v62 = vpack.c.bf16 %v1133_v61, %v1133_v61 }
0x107b   :  { %1215 = vrot.lane.b32.xlu1 %v1213_v62, %s2083_s7 }
0x10e8   :  { %v1140_v63 = vpop.permute.xlu0 %1139 }
0x10e9   :  { %v1136_v0 = vpop.permute.xlu1 %1135 }
0x10ea   :  { %v1142_v2 = vsel %vm283_vm2, %v1136_v0, %v1140_v63 }
0x10eb   :  { %v1143_v3 = vpack.c.bf16 %v1142_v2, %v1142_v2 }
0x10ed   :  { %1770 = vmatmul.mubr.msk.bf16.vlgmr.msra.gmra.mrb[20].mxu1 %vm388_vm3, %v1143_v3  ;;  %v1216_v4 = vpop.permute.xlu1 %1215 }
0x10ee   :  { %1778 = vmatmul.mubr.msk.bf16.vlgmr.msra.gmra.mrb[28].mxu0 %vm283_vm2, %v1216_v4  ;;  %1794 = vmatpush3.bf16.msra.mxu1 %v2204_v21 }
0x10ef   :  { %1782 = vmatpush3.bf16.msra.mxu0 %v2228_v6  ;;  %1795 = vmatprep.subr.bf16.mxu1 %v2090_v1 }
0x10f0   :  { %1783 = vmatprep.subr.bf16.mxu0 %v2090_v1  ;;  %1789 = vmatprep.mubr.msk.bf16.mxu0 %vm2091_vm0, %v2090_v1 }
0x10f1   :  { %1797 = vmatprep.mubr.msk.bf16.mxu1 %vm2091_vm0, %v2090_v1 }
0x10f2   :  { %1796 = vmatpush3.bf16.msra.mxu1 %v2208_v27 }
0x10f3   :  { %1784 = vmatpush3.bf16.msra.mxu0 %v2231_v7  ;;  %1801 = vmatprep.subr.bf16.mxu1 %v2090_v1 }
0x10f4   :  { %1785 = vmatprep.subr.bf16.mxu0 %v2090_v1 }
0x10f7   :  { %1786 = vmatpush3.bf16.msra.mxu0 %v2235_v8 }
0x10f8   :  { %1787 = vmatprep.subr.bf16.mxu0 %v2090_v1 }
0x10fb   :  { %1788 = vmatpush3.bf16.msra.mxu0 %v2241_v10 }
0x11c0   :  { %v1181_v21 = vpop.f32.mrb[20].mxu1 }
0x11c1   :  { %v1182_v5 = vadd.f32 %v2269_v18, %v1181_v21  ;;  %v1771_v9 = vpop.f32.mrb[21].mxu1  ;;  %v1254_v12 = vpop.f32.mrb[28].mxu0 }
0x11c2   :  { %v1260_v13 = vadd.f32 %v1254_v12, %v1212_v11  ;;  %v1184_v27 = vpop.f32.mrb[22].mxu1  ;;  %v1779_v14 = vpop.f32.mrb[29].mxu0 }
0x11c3   :  { %1924 = vtanh.f32 %v1182_v5  ;;  %v1772_v15 = vpop.f32.mrb[23].mxu1  ;;  %v1257_v16 = vpop.f32.mrb[30].mxu0  ;;  %v1572_v22 = vmul.f32 -1.442695, %v1182_v5 }
0x11c4   :  { %1926 = vtanh.f32 %v1260_v13  ;;  %v1780_v17 = vpop.f32.mrb[31].mxu0  ;;  %v1574_v23 = vmul.f32 -1.442695, %v1260_v13 }
0x11c5   :  { %1928 = vpow2.f32 %v1572_v22 }
0x11c6   :  { %1930 = vpow2.f32 %v1574_v23 }
0x11cd   :  { %v1925_v19 = vpop.eup %1924 }
0x11ce   :  { %v1927_v20 = vpop.eup %1926  ;;  %1196 = vrot.lane.b32.xlu0 %v1925_v19, %s2095_s3 }
0x11cf   :  { %1270 = vrot.lane.b32.xlu1 %v1927_v20, %s2095_s3  ;;  %v1929_v24 = vpop.eup %1928 }
0x11d0   :  { %v1931_v25 = vpop.eup %1930  ;;  %v1190_v26 = vadd.f32 1.0, %v1929_v24 }
0x11d1   :  { %v1264_v28 = vadd.f32 1.0, %v1931_v25 }
0x11d2   :  { %1932 = vrcp.f32 %v1190_v26 }
0x11d3   :  { %1934 = vrcp.f32 %v1264_v28 }
0x11dc   :  { %v1933_v29 = vpop.eup %1932 }
0x11dd   :  { %v1935_v31 = vpop.eup %1934  ;;  %v1194_v35 = vmul.f32 %v1933_v29, %v2425_v53 }
0x11de   :  { %v1268_v37 = vmul.f32 %v1935_v31, %v2427_v55 }
0x1240   :  { %v1197_v30 = vpop.permute.xlu0 %1196 }
0x1241   :  { %v1199_v32 = vmul.f32 %v1933_v29, %v1197_v30  ;;  %v1271_v33 = vpop.permute.xlu1 %1270 }
0x1242   :  { %v1273_v34 = vmul.f32 %v1935_v31, %v1271_v33 }
0x1243   :  { %1201 = vrot.lane.b32.xlu0 %v1199_v32, %s2095_s3 }
0x1244   :  { %1275 = vrot.lane.b32.xlu1 %v1273_v34, %s2095_s3 }
0x12b5   :  { %v1202_v36 = vpop.permute.xlu0 %1201 }
0x12b6   :  { %v2461_v38 = vadd.f32 %v1202_v36, %v1194_v35  ;;  %v1276_v39 = vpop.permute.xlu1 %1275 }
0x12b7   :  { %v2463_v40 = vadd.f32 %v1276_v39, %v1268_v37 }
0x12b8   :  { %1936 = vtanh.f32 %v2461_v38 }
0x12b9   :  { %1938 = vtanh.f32 %v2463_v40 }
0x12c2   :  { %v1937_v41 = vpop.eup %1936 }
0x12c3   :  { %v1939_v42 = vpop.eup %1938  ;;  %1207 = vrot.lane.b32.xlu0 %v1937_v41, %s2095_s3 }
0x12c4   :  { %1281 = vrot.lane.b32.xlu1 %v1939_v42, %s2095_s3 }
0x1335   :  { %v1208_v43 = vpop.permute.xlu0 %1207 }
0x1336   :  { %v1210_v44 = vmul.f32 %v1933_v29, %v1208_v43  ;;  %v1282_v45 = vpop.permute.xlu1 %1281 }
0x1337   :  { %v1284_v46 = vmul.f32 %v1935_v31, %v1282_v45 }
0x1338   :  { %1290 = vrot.lane.b32.xlu1 %v1210_v44, %s2096_s5 }
0x1339   :  { %1286 = vrot.lane.b32.xlu0 %v1284_v46, %s2083_s7  ;;  %v1364_v47 = vpack.c.bf16 %v1284_v46, %v1284_v46 }
0x133d   :  { %1366 = vrot.lane.b32.xlu0 %v1364_v47, %s2083_s7 }
0x13aa   :  { %v1291_v48 = vpop.permute.xlu1 %1290 }
0x13ab   :  { %v1287_v49 = vpop.permute.xlu0 %1286 }
0x13ac   :  { %v1293_v50 = vsel %vm283_vm2, %v1287_v49, %v1291_v48 }
0x13ad   :  { %v1294_v51 = vpack.c.bf16 %v1293_v50, %v1293_v50 }
0x13af   :  { %v1367_v52 = vpop.permute.xlu0 %1366  ;;  %1790 = vmatmul.mubr.msk.bf16.vlgmr.msra.gmra.mrb[32].mxu0 %vm388_vm3, %v1294_v51 }
0x13b0   :  { %1798 = vmatmul.mubr.msk.bf16.vlgmr.msra.gmra.mrb[24].mxu1 %vm283_vm2, %v1367_v52 }
0x13b1   :  { %1802 = vmatpush3.bf16.msra.mxu1 %v2228_v6  ;;  %1809 = vmatprep.mubr.msk.bf16.mxu1 %vm2091_vm0, %v2090_v1  ;;  %v1363_v6 = vld [vmem:[#allocation2 + $0xe] sm:$0x3] }
0x13b2   :  { %1803 = vmatprep.subr.bf16.mxu1 %v2090_v1 }
0x13b5   :  { %1804 = vmatpush3.bf16.msra.mxu1 %v2231_v7 }
0x13b6   :  { %1805 = vmatprep.subr.bf16.mxu1 %v2090_v1 }
0x13b9   :  { %1806 = vmatpush3.bf16.msra.mxu1 %v2235_v8 }
0x13ba   :  { %1807 = vmatprep.subr.bf16.mxu1 %v2090_v1 }
0x13bd   :  { %1808 = vmatpush3.bf16.msra.mxu1 %v2241_v10 }
0x1482   :  { %v1332_v53 = vpop.f32.mrb[32].mxu0 }
0x1483   :  { %v1333_v54 = vadd.f32 %v2269_v18, %v1332_v53  ;;  %v1791_v55 = vpop.f32.mrb[33].mxu0  ;;  %v1405_v56 = vpop.f32.mrb[24].mxu1 }
0x1484   :  { %v1411_v57 = vadd.f32 %v1405_v56, %v1363_v6  ;;  %v1335_v58 = vpop.f32.mrb[34].mxu0  ;;  %v1799_v59 = vpop.f32.mrb[25].mxu1 }
0x1485   :  { %1940 = vtanh.f32 %v1333_v54  ;;  %v1792_v60 = vpop.f32.mrb[35].mxu0  ;;  %v1408_v7 = vpop.f32.mrb[26].mxu1  ;;  %v1576_v1 = vmul.f32 -1.442695, %v1333_v54 }
0x1486   :  { %1942 = vtanh.f32 %v1411_v57  ;;  %v1800_v61 = vpop.f32.mrb[27].mxu1  ;;  %v1578_v10 = vmul.f32 -1.442695, %v1411_v57 }
0x1487   :  { %1944 = vpow2.f32 %v1576_v1 }
0x1488   :  { %1946 = vpow2.f32 %v1578_v10 }
0x148f   :  { %v1941_v62 = vpop.eup %1940 }
0x1490   :  { %v1943_v8 = vpop.eup %1942  ;;  %1347 = vrot.lane.b32.xlu1 %v1941_v62, %s2095_s3 }
0x1491   :  { %1421 = vrot.lane.b32.xlu0 %v1943_v8, %s2095_s3  ;;  %v1945_v63 = vpop.eup %1944 }
0x1492   :  { %v1947_v0 = vpop.eup %1946  ;;  %v1341_v2 = vadd.f32 1.0, %v1945_v63 }
0x1493   :  { %v1415_v3 = vadd.f32 1.0, %v1947_v0 }
0x1494   :  { %1948 = vrcp.f32 %v1341_v2 }
0x1495   :  { %1950 = vrcp.f32 %v1415_v3 }
0x149e   :  { %v1949_v4 = vpop.eup %1948 }
0x149f   :  { %v1951_v5 = vpop.eup %1950  ;;  %v1345_v13 = vmul.f32 %v1949_v4, %v2461_v38 }
0x14a0   :  { %v1419_v14 = vmul.f32 %v1951_v5, %v2463_v40 }
0x1502   :  { %v1348_v21 = vpop.permute.xlu1 %1347 }
0x1503   :  { %v1350_v9 = vmul.f32 %v1949_v4, %v1348_v21  ;;  %v1422_v11 = vpop.permute.xlu0 %1421 }
0x1504   :  { %v1424_v12 = vmul.f32 %v1951_v5, %v1422_v11 }
0x1505   :  { %1352 = vrot.lane.b32.xlu1 %v1350_v9, %s2095_s3 }
0x1506   :  { %1426 = vrot.lane.b32.xlu0 %v1424_v12, %s2095_s3 }
0x1577   :  { %v1353_v27 = vpop.permute.xlu1 %1352 }
0x1578   :  { %v1355_v15 = vadd.f32 %v1353_v27, %v1345_v13  ;;  %v1427_v16 = vpop.permute.xlu0 %1426 }
0x1579   :  { %v1429_v17 = vadd.f32 %v1427_v16, %v1419_v14 }
0x157a   :  { %1952 = vtanh.f32 %v1355_v15 }
0x157b   :  { %1954 = vtanh.f32 %v1429_v17 }
0x1584   :  { %v1953_v19 = vpop.eup %1952 }
0x1585   :  { %v1955_v20 = vpop.eup %1954  ;;  %1358 = vrot.lane.b32.xlu1 %v1953_v19, %s2095_s3 }
0x1586   :  { %1432 = vrot.lane.b32.xlu0 %v1955_v20, %s2095_s3 }
0x15f7   :  { %v1359_v22 = vpop.permute.xlu1 %1358 }
0x15f8   :  { %v1361_v23 = vmul.f32 %v1949_v4, %v1359_v22  ;;  %v1433_v24 = vpop.permute.xlu0 %1432 }
0x15f9   :  { %v1435_v25 = vmul.f32 %v1951_v5, %v1433_v24 }
0x15fa   :  { %1441 = vrot.lane.b32.xlu0 %v1361_v23, %s2096_s5 }
0x15fb   :  { %1437 = vrot.lane.b32.xlu1 %v1435_v25, %s2083_s7 }
0x166c   :  { %v1442_v26 = vpop.permute.xlu0 %1441 }
0x166d   :  { %v1438_v28 = vpop.permute.xlu1 %1437 }
0x166e   :  { %v1444_v29 = vsel %vm283_vm2, %v1438_v28, %v1442_v26 }
0x166f   :  { %v1445_v30 = vpack.c.bf16 %v1444_v29, %v1444_v29 }
0x1671   :  { %1810 = vmatmul.mubr.msk.bf16.vlgmr.msra.gmra.mrb[28].mxu1 %vm388_vm3, %v1445_v30 }
0x1744   :  { %v1483_v31 = vpop.f32.mrb[28].mxu1 }
0x1745   :  { %v1484_v32 = vadd.f32 %v2269_v18, %v1483_v31  ;;  %v1811_v33 = vpop.f32.mrb[29].mxu1 }
0x1746   :  { %v1486_v34 = vpop.f32.mrb[30].mxu1 }
0x1747   :  { %1956 = vtanh.f32 %v1484_v32  ;;  %v1812_v35 = vpop.f32.mrb[31].mxu1  ;;  %v1580_v37 = vmul.f32 -1.442695, %v1484_v32 }
0x1749   :  { %1958 = vpow2.f32 %v1580_v37 }
0x1751   :  { %v1957_v36 = vpop.eup %1956 }
0x1752   :  { %1498 = vrot.lane.b32.xlu1 %v1957_v36, %s2095_s3 }
0x1753   :  { %v1959_v38 = vpop.eup %1958 }
0x1754   :  { %v1492_v39 = vadd.f32 1.0, %v1959_v38 }
0x1756   :  { %1960 = vrcp.f32 %v1492_v39 }
0x1760   :  { %v1961_v40 = vpop.eup %1960 }
0x1761   :  { %v1496_v43 = vmul.f32 %v1961_v40, %v1355_v15 }
0x17c4   :  { %v1499_v41 = vpop.permute.xlu1 %1498 }
0x17c5   :  { %v1501_v42 = vmul.f32 %v1961_v40, %v1499_v41 }
0x17c7   :  { %1503 = vrot.lane.b32.xlu0 %v1501_v42, %s2095_s3 }
0x1839   :  { %v1504_v44 = vpop.permute.xlu0 %1503 }
0x183a   :  { %v1506_v18 = vadd.f32 %v1504_v44, %v1496_v43 }
0x183c   :  { %1962 = vtanh.f32 %v1506_v18 }
0x1846   :  { %v1963_v45 = vpop.eup %1962 }
0x1847   :  { %1509 = vrot.lane.b32.xlu1 %v1963_v45, %s2095_s3 }
0x18b9   :  { %v1510_v46 = vpop.permute.xlu1 %1509 }
0x18ba   :  { %v1512_v47 = vmul.f32 %v1961_v40, %v1510_v46 }
0x18bc   :  { %1514 = vrot.lane.b32.xlu0 %v1512_v47, %s2083_s7 }
0x192e   :  { %v1515_v48 = vpop.permute.xlu0 %1514 }
0x192f   :  { %1518 = vst.msk [vmem:[#allocation11] sm:$0x3] %vm1517_vm4, %v1515_v48 }
0x1930   :  { %2063 = shalt.err (!%p2060_p8)
}
0x1931   :  { %s2064_s30 = scalar_lea.hbm %s2520_s6, 32 }
0x1932   :  { %p2065_p9 = scmp.ne.s32.totalorder %s2520_s6, %s2064_s30  ;;  %p2068_p10 = scmp.lt.u32.totalorder %s2064_s30, %s2520_s6 }
0x1934   :  { %p2070_p11 = pnand %p2068_p10, %p2065_p9 }
0x1936   :  { %2073 = shalt.err (!%p2070_p11)
}
0x1937   :  { %1528 = dma.vmem_to_hbm [thread:$0]  %s1526_s26, 32, %s2520_s6, [#allocation5]  }
0x1938   :  { %2080 = dma.done.wait [#allocation5], 32  }
0x1939   :  { %2081 = vsyncadd [#allocation5], 4294967264 }
0x193a   :  { %1532 = vsyncpa [#allocation4], 1 }
0x193b   :  { %1533 = vsyncpa [#allocation7], 1 }
0x193c   :  { %1534 = vsyncpa [#allocation10], 1 }
0x193d   :  { %1535 = vsyncpa [#allocation5], 1 }

</bundles_post_ra>
